<compile_context>
chip_gen: v6e
topology: v6e:2x2x1
jax: 0.10.0
libtpu: 0.0.40
codegen_flags: <defaults>
</compile_context>

<pallas_src>
import functools
import math

import jax
import jax.numpy as jnp
from jax.experimental import pallas as pl
from jax.experimental.pallas import tpu as pltpu


# Deterministic Rational() reset_parameters() init (degree-(3,3) fit of ReLU):
#   P(x) = 1.1915 x^3 + 1.5957 x^2 + 0.5 x + 0.0218
#   Q(x) = 1 + |2.383 x^2|
_DEFAULT_RAT_NUM = (0.0218, 0.5, 1.5957, 1.1915)   # a0, a1, a2, a3
_DEFAULT_RAT_DEN = (0.0, 2.383, 0.0)                # b1, b2, b3

_MAX_T_TILE = 4096          # lane-axis tile cap (multiple of 128)
_MAX_BATCH_BLOCK = 8        # batch rows folded into one grid step (small-T regime)
_MXU_PRECISION = jax.lax.Precision.HIGHEST


def _horner(h, coeffs):
    """Evaluate sum_i coeffs[i] * h**i with compile-time Python floats.
    Zero terms are dropped at trace time (any polynomial degree supported)."""
    cs = [float(c) for c in coeffs]
    while len(cs) > 1 and cs[-1] == 0.0:
        cs.pop()
    if len(cs) == 1:
        return jnp.full_like(h, cs[0])
    acc = cs[-1] * h
    for c in reversed(cs[1:-1]):
        if c != 0.0:
            acc = acc + c
        acc = acc * h
    if cs[0] != 0.0:
        acc = acc + cs[0]
    return acc


def _rational(h, coefs, approx_recip):
    """PAU 'version A': P(h) / (1 + |b1 h + b2 h^2 + b3 h^3|).  Denominator is
    >= 1 by construction, so the EUP approximate reciprocal is always safe."""
    num, den = coefs
    p = _horner(h, num)
    d = _horner(h, (0.0,) + tuple(den))
    q = 1.0 + jnp.abs(d)
    # Divide -> EUP reciprocal + VPU multiply (EUP slot is otherwise idle here).
    return p * pl.reciprocal(q, approx=approx_recip)


def _mlp_kernel(x_ref, w1_ref, w23_ref, w4_ref, b_ref, o_ref, *,
                rat_coefs, approx_recip):
    # x_ref: (bb, in_c, T_TILE)  o_ref: (bb, out_c, T_TILE)
    # w1_ref: (H, in_c)  w23_ref: (2, H, H)  w4_ref: (out_c, H)  [all W^T]
    # b_ref: (3H + out_c, 1) column vector, factor folded into layer 4.
    hidden = w1_ref.shape[0]
    out_c = w4_ref.shape[0]
    bb = x_ref.shape[0]

    w1 = w1_ref[...]
    w2 = w23_ref[0]
    w3 = w23_ref[1]
    w4 = w4_ref[...]
    b1 = b_ref[0:hidden, :]
    b2 = b_ref[hidden:2 * hidden, :]
    b3 = b_ref[2 * hidden:3 * hidden, :]
    b4 = b_ref[3 * hidden:3 * hidden + out_c, :]

    dot = functools.partial(jnp.dot, preferred_element_type=jnp.float32,
                            precision=_MXU_PRECISION)

    # Static unroll over the batch block: bb plain 2-D (H,K)x(K,T) MXU matmuls,
    # all intermediates lane-dense on the T axis.
    for i in range(bb):
        h = dot(w1, x_ref[i]) + b1
        h = _rational(h, rat_coefs[0], approx_recip)
        h = dot(w2, h) + b2
        h = _rational(h, rat_coefs[1], approx_recip)
        h = dot(w3, h) + b3
        h = _rational(h, rat_coefs[2], approx_recip)
        # `factor` is already folded into w4/b4 by prepare_params().
        o_ref[i] = (dot(w4, h) + b4).astype(o_ref.dtype)


def init_params(key, in_c, out_c, hidden):
    """Deterministic parameter init (PyTorch-Linear-style uniform bounds) plus
    the default Rational coefficients (trace-time constants)."""
    dims = [(in_c, hidden), (hidden, hidden), (hidden, hidden), (hidden, out_c)]
    params = {}
    keys = jax.random.split(key, 2 * len(dims))
    for i, (fi, fo) in enumerate(dims):
        bound = 1.0 / math.sqrt(fi)
        params[f"w{i + 1}"] = jax.random.uniform(
            keys[2 * i], (fi, fo), jnp.float32, -bound, bound)
        params[f"b{i + 1}"] = jax.random.uniform(
            keys[2 * i + 1], (1, fo), jnp.float32, -bound, bound)
    params["rational"] = tuple(
        (_DEFAULT_RAT_NUM, _DEFAULT_RAT_DEN) for _ in range(3))
    return params


def prepare_params(params, factor):
    """One-time layout/scale prep (hoist this out of hot call paths):
    transpose weights to feature-major (W^T), stack the two hidden-layer
    weights, concatenate biases into one column vector, fold `factor` into the
    last layer, and carry the per-layer rational coefficients."""
    f = jnp.float32(factor)
    b_all = jnp.concatenate([
        params["b1"].reshape(-1), params["b2"].reshape(-1),
        params["b3"].reshape(-1), (params["b4"] * f).reshape(-1)]).reshape(-1, 1)
    return {
        "w1t": params["w1"].T,                                   # (H, in_c)
        "w23t": jnp.stack([params["w2"].T, params["w3"].T]),     # (2, H, H)
        "w4t": (params["w4"] * f).T,                             # (out_c, H)
        "b_all": b_all,                                          # (3H + out_c, 1)
        "rat": params["rational"],
    }


def _choose_tiles(B, T, max_t_tile):
    """Pick (batch_block, t_tile, padded_T)."""
    max_t_tile = max(128, (int(max_t_tile) // 128) * 128)
    if T <= max_t_tile:
        t_tile, t_pad = T, T                      # full-extent lane tile
    else:
        t_tile = max_t_tile
        t_pad = pl.cdiv(T, t_tile) * t_tile       # pad up, never shrink the tile
    # Batch blocking: only needed when the per-step lane work is small.
    bb = 1
    if t_tile < max_t_tile:
        for cand in (_MAX_BATCH_BLOCK, 4, 2):
            if B % cand == 0 and cand * t_tile <= 2 * max_t_tile:
                bb = cand
                break
    # Keep >= 2 grid steps when possible so v7x's two TensorCores both get work.
    if (B // bb) * (t_pad // t_tile) < 2:
        if bb > 1:
            bb //= 2
        elif t_tile % 256 == 0:
            t_tile //= 2
    return bb, t_tile, t_pad


def mlp_forward(x, prepared, *, max_t_tile=_MAX_T_TILE, approx_recip=True):
    """Forward pass of MLPEstimatorRational using pre-prepared parameters.

    x: (B, in_c, T) — the module's 3-D path (transpose-free: T stays on lanes)
       or (N, in_c) — the 2-D path (one small wrapper transpose).
    """
    squeeze_2d = x.ndim == 2
    if squeeze_2d:
        x = jnp.transpose(x, (1, 0))[None]        # (1, in_c, N): N on lanes

    B, nc, T = x.shape
    hidden = prepared["w1t"].shape[0]
    out_c = prepared["w4t"].shape[0]

    bb, t_tile, t_pad = _choose_tiles(B, T, max_t_tile)
    if t_pad != T:
        x = jnp.pad(x, ((0, 0), (0, 0), (0, t_pad - T)))

    grid = (B // bb, t_pad // t_tile)

    # Scoped-VMEM budget: double-buffered in/out blocks + generous allowance for
    # the live f32 intermediates + (tiny) parameters.  Clamped to [16, 32] MiB:
    # >= v5e's 16 MiB scoped default, <= v7x's 32 MiB scoped / 64 MiB physical.
    vmem_bytes = 4 * (2 * bb * (nc + out_c) * t_tile
                      + 8 * hidden * bb * t_tile
                      + 2 * (hidden * nc + 2 * hidden * hidden
                             + out_c * hidden + 3 * hidden + out_c))
    vmem_limit = int(min(max(vmem_bytes + (1 << 20), 16 << 20), 32 << 20))

    kernel = functools.partial(_mlp_kernel, rat_coefs=prepared["rat"],
                               approx_recip=approx_recip)

    out = pl.pallas_call(
        kernel,
        out_shape=jax.ShapeDtypeStruct((B, out_c, t_pad), x.dtype),
        grid=grid,
        in_specs=[
            pl.BlockSpec((bb, nc, t_tile), lambda b, t: (b, 0, t)),     # x
            pl.BlockSpec((hidden, nc), lambda b, t: (0, 0)),            # w1^T
            pl.BlockSpec((2, hidden, hidden), lambda b, t: (0, 0, 0)),  # w2^T,w3^T
            pl.BlockSpec((out_c, hidden), lambda b, t: (0, 0)),         # w4^T * f
            pl.BlockSpec((3 * hidden + out_c, 1), lambda b, t: (0, 0)), # biases
        ],
        out_specs=pl.BlockSpec((bb, out_c, t_tile), lambda b, t: (b, 0, t)),
        compiler_params=pltpu.CompilerParams(
            dimension_semantics=("parallel", "parallel"),
            vmem_limit_bytes=vmem_limit),
    )(x, prepared["w1t"], prepared["w23t"], prepared["w4t"], prepared["b_all"])

    if t_pad != T:
        out = out[:, :, :T]
    if squeeze_2d:
        out = jnp.transpose(out[0], (1, 0))
    return out


def mlp_estimator_rational(x, params, factor, **kwargs):
    """Convenience wrapper. In hot loops call prepare_params() once and use
    mlp_forward() directly (the prep is pure layout plumbing)."""
    return mlp_forward(x, prepare_params(params, factor), **kwargs)


def _reference(x, params, factor):
    """Pure-JAX reference identical to the PyTorch forward."""
    flatten = x.ndim == 3
    h = jnp.transpose(x, (0, 2, 1)) if flatten else x

    def rational(v, coefs):
        num, den = coefs
        p = sum(float(c) * v ** i for i, c in enumerate(num))
        d = sum(float(c) * v ** (i + 1) for i, c in enumerate(den))
        return p / (1.0 + jnp.abs(d))

    mm = functools.partial(jnp.matmul, precision=_MXU_PRECISION)
    rat = params["rational"]
    h = rational(mm(h, params["w1"]) + params["b1"], rat[0])
    h = rational(mm(h, params["w2"]) + params["b2"], rat[1])
    h = rational(mm(h, params["w3"]) + params["b3"], rat[2])
    h = (mm(h, params["w4"]) + params["b4"]) * factor
    return jnp.transpose(h, (0, 2, 1)) if flatten else h


if __name__ == "__main__":
    in_c, out_c, hidden, factor = 4, 4, 32, 0.5

    key = jax.random.PRNGKey(0)
    k_param, k1, k2, k3, k4 = jax.random.split(key, 5)
    params = init_params(k_param, in_c, out_c, hidden)
    prepared = prepare_params(params, factor)   # hoisted out of the call path

    cases = [
        # (name, input, wrapper kwargs)
        ("3d_small", jax.random.normal(k1, (2, in_c, 8), jnp.float32), {}),
        # B-dominated: exercises batch blocking (bb > 1).
        ("3d_batch_block", jax.random.normal(k2, (8, in_c, 128), jnp.float32), {}),
        # T > tile: exercises the pad-to-tile-multiple + multi-tile grid path.
        ("3d_tiled_padded", jax.random.normal(k3, (2, in_c, 1000), jnp.float32),
         dict(max_t_tile=512)),
        # 2-D secondary path (N, in_c).
        ("2d", jax.random.normal(k4, (16, in_c), jnp.float32), {}),
    ]

    for name, x, kw in cases:
        y_ref = _reference(x, params, factor)

        # Fast (shipped) path: EUP approximate reciprocal (always safe: Q >= 1).
        y_fast = jax.block_until_ready(mlp_forward(x, prepared, **kw))
        assert y_fast.shape == y_ref.shape, (name, y_fast.shape, y_ref.shape)
        assert jnp.allclose(y_fast, y_ref, atol=5e-3, rtol=5e-3), \
            f"mismatch vs reference (approx reciprocal): {name}"

        # Structural exactness check with the full-precision reciprocal.
        y_exact = jax.block_until_ready(
            mlp_forward(x, prepared, approx_recip=False, **kw))
        assert jnp.allclose(y_exact, y_ref, atol=1e-4, rtol=1e-4), \
            f"mismatch vs reference (exact reciprocal): {name}"

    print("KERNEL_OK")
</pallas_src>

<mosaic_0001>
module attributes {stable_mosaic.version = 11 : i64} {
  func.func @_mlp_kernel(%arg0: i32, %arg1: i32, %arg2: memref<1x4x8xf32, #tpu.memory_space<vmem>>, %arg3: memref<32x4xf32, #tpu.memory_space<vmem>>, %arg4: memref<2x32x32xf32, #tpu.memory_space<vmem>>, %arg5: memref<4x32xf32, #tpu.memory_space<vmem>>, %arg6: memref<100x1xf32, #tpu.memory_space<vmem>>, %arg7: memref<1x4x8xf32, #tpu.memory_space<vmem>>) attributes {dimension_semantics = [#tpu.dimension_semantics<parallel>, #tpu.dimension_semantics<parallel>], iteration_bounds = array<i64: 2, 1>, scalar_prefetch = 0 : i64, scratch_operands = 0 : i64, tpu.core_type = #tpu.core_type<tc>, window_params = [{transform_indices = @transform_0, window_bounds = array<i64: 1, 4, 8>}, {pipeline_mode = #tpu.pipeline_mode<synchronous>, transform_indices = @transform_1, window_bounds = array<i64: 32, 4>}, {pipeline_mode = #tpu.pipeline_mode<synchronous>, transform_indices = @transform_2, window_bounds = array<i64: 2, 32, 32>}, {pipeline_mode = #tpu.pipeline_mode<synchronous>, transform_indices = @transform_3, window_bounds = array<i64: 4, 32>}, {pipeline_mode = #tpu.pipeline_mode<synchronous>, transform_indices = @transform_4, window_bounds = array<i64: 100, 1>}, {transform_indices = @transform_5, window_bounds = array<i64: 1, 4, 8>}]} {
    %c0 = arith.constant 0 : index
    %c0_0 = arith.constant 0 : index
    %0 = vector.load %arg3[%c0, %c0_0] : memref<32x4xf32, #tpu.memory_space<vmem>>, vector<32x4xf32>
    %c0_1 = arith.constant 0 : index
    %c0_2 = arith.constant 0 : index
    %c0_3 = arith.constant 0 : index
    %1 = vector.load %arg4[%c0_1, %c0_2, %c0_3] : memref<2x32x32xf32, #tpu.memory_space<vmem>>, vector<1x32x32xf32>
    %2 = vector.shape_cast %1 : vector<1x32x32xf32> to vector<32x32xf32>
    %c1 = arith.constant 1 : index
    %c0_4 = arith.constant 0 : index
    %c0_5 = arith.constant 0 : index
    %3 = vector.load %arg4[%c1, %c0_4, %c0_5] : memref<2x32x32xf32, #tpu.memory_space<vmem>>, vector<1x32x32xf32>
    %4 = vector.shape_cast %3 : vector<1x32x32xf32> to vector<32x32xf32>
    %c0_6 = arith.constant 0 : index
    %c0_7 = arith.constant 0 : index
    %5 = vector.load %arg5[%c0_6, %c0_7] : memref<4x32xf32, #tpu.memory_space<vmem>>, vector<4x32xf32>
    %c0_8 = arith.constant 0 : index
    %c0_9 = arith.constant 0 : index
    %6 = vector.load %arg6[%c0_8, %c0_9] : memref<100x1xf32, #tpu.memory_space<vmem>>, vector<32x1xf32>
    %c32 = arith.constant 32 : index
    %c0_10 = arith.constant 0 : index
    %7 = vector.load %arg6[%c32, %c0_10] : memref<100x1xf32, #tpu.memory_space<vmem>>, vector<32x1xf32>
    %c64 = arith.constant 64 : index
    %c0_11 = arith.constant 0 : index
    %8 = vector.load %arg6[%c64, %c0_11] : memref<100x1xf32, #tpu.memory_space<vmem>>, vector<32x1xf32>
    %c96 = arith.constant 96 : index
    %c0_12 = arith.constant 0 : index
    %9 = vector.load %arg6[%c96, %c0_12] : memref<100x1xf32, #tpu.memory_space<vmem>>, vector<4x1xf32>
    %c0_13 = arith.constant 0 : index
    %c0_14 = arith.constant 0 : index
    %c0_15 = arith.constant 0 : index
    %10 = vector.load %arg2[%c0_13, %c0_14, %c0_15] : memref<1x4x8xf32, #tpu.memory_space<vmem>>, vector<1x4x8xf32>
    %11 = vector.shape_cast %10 : vector<1x4x8xf32> to vector<4x8xf32>
    %cst = arith.constant dense<0.000000e+00> : vector<32x8xf32>
    %12 = tpu.matmul %0, %11, %cst {dimension_numbers = #tpu.dot_dimension_numbers<[1], [0], [0], [1], [0, 0, 1, 1], [], []>, precision = #tpu.contract_precision<fp32>} : vector<32x4xf32>, vector<4x8xf32>, vector<32x8xf32> -> vector<32x8xf32>
    %13 = vector.broadcast %6 : vector<32x1xf32> to vector<32x8xf32>
    %14 = arith.addf %12, %13 : vector<32x8xf32>
    %cst_16 = arith.constant 1.191500e+00 : f32
    %15 = vector.broadcast %cst_16 : f32 to vector<32x8xf32>
    %16 = arith.mulf %15, %14 : vector<32x8xf32>
    %cst_17 = arith.constant 1.595700e+00 : f32
    %17 = vector.broadcast %cst_17 : f32 to vector<32x8xf32>
    %18 = arith.addf %16, %17 : vector<32x8xf32>
    %19 = arith.mulf %18, %14 : vector<32x8xf32>
    %cst_18 = arith.constant 5.000000e-01 : f32
    %20 = vector.broadcast %cst_18 : f32 to vector<32x8xf32>
    %21 = arith.addf %19, %20 : vector<32x8xf32>
    %22 = arith.mulf %21, %14 : vector<32x8xf32>
    %cst_19 = arith.constant 2.180000e-02 : f32
    %23 = vector.broadcast %cst_19 : f32 to vector<32x8xf32>
    %24 = arith.addf %22, %23 : vector<32x8xf32>
    %cst_20 = arith.constant 2.383000e+00 : f32
    %25 = vector.broadcast %cst_20 : f32 to vector<32x8xf32>
    %26 = arith.mulf %25, %14 : vector<32x8xf32>
    %27 = arith.mulf %26, %14 : vector<32x8xf32>
    %28 = math.absf %27 : vector<32x8xf32>
    %cst_21 = arith.constant 1.000000e+00 : f32
    %29 = vector.broadcast %cst_21 : f32 to vector<32x8xf32>
    %30 = arith.addf %29, %28 : vector<32x8xf32>
    %31 = tpu.reciprocal %30 {approx = true} : vector<32x8xf32> -> vector<32x8xf32>
    %32 = arith.mulf %24, %31 : vector<32x8xf32>
    %cst_22 = arith.constant dense<0.000000e+00> : vector<32x8xf32>
    %33 = tpu.matmul %2, %32, %cst_22 {dimension_numbers = #tpu.dot_dimension_numbers<[1], [0], [0], [1], [0, 0, 1, 1], [], []>, precision = #tpu.contract_precision<fp32>} : vector<32x32xf32>, vector<32x8xf32>, vector<32x8xf32> -> vector<32x8xf32>
    %34 = vector.broadcast %7 : vector<32x1xf32> to vector<32x8xf32>
    %35 = arith.addf %33, %34 : vector<32x8xf32>
    %cst_23 = arith.constant 1.191500e+00 : f32
    %36 = vector.broadcast %cst_23 : f32 to vector<32x8xf32>
    %37 = arith.mulf %36, %35 : vector<32x8xf32>
    %cst_24 = arith.constant 1.595700e+00 : f32
    %38 = vector.broadcast %cst_24 : f32 to vector<32x8xf32>
    %39 = arith.addf %37, %38 : vector<32x8xf32>
    %40 = arith.mulf %39, %35 : vector<32x8xf32>
    %cst_25 = arith.constant 5.000000e-01 : f32
    %41 = vector.broadcast %cst_25 : f32 to vector<32x8xf32>
    %42 = arith.addf %40, %41 : vector<32x8xf32>
    %43 = arith.mulf %42, %35 : vector<32x8xf32>
    %cst_26 = arith.constant 2.180000e-02 : f32
    %44 = vector.broadcast %cst_26 : f32 to vector<32x8xf32>
    %45 = arith.addf %43, %44 : vector<32x8xf32>
    %cst_27 = arith.constant 2.383000e+00 : f32
    %46 = vector.broadcast %cst_27 : f32 to vector<32x8xf32>
    %47 = arith.mulf %46, %35 : vector<32x8xf32>
    %48 = arith.mulf %47, %35 : vector<32x8xf32>
    %49 = math.absf %48 : vector<32x8xf32>
    %cst_28 = arith.constant 1.000000e+00 : f32
    %50 = vector.broadcast %cst_28 : f32 to vector<32x8xf32>
    %51 = arith.addf %50, %49 : vector<32x8xf32>
    %52 = tpu.reciprocal %51 {approx = true} : vector<32x8xf32> -> vector<32x8xf32>
    %53 = arith.mulf %45, %52 : vector<32x8xf32>
    %cst_29 = arith.constant dense<0.000000e+00> : vector<32x8xf32>
    %54 = tpu.matmul %4, %53, %cst_29 {dimension_numbers = #tpu.dot_dimension_numbers<[1], [0], [0], [1], [0, 0, 1, 1], [], []>, precision = #tpu.contract_precision<fp32>} : vector<32x32xf32>, vector<32x8xf32>, vector<32x8xf32> -> vector<32x8xf32>
    %55 = vector.broadcast %8 : vector<32x1xf32> to vector<32x8xf32>
    %56 = arith.addf %54, %55 : vector<32x8xf32>
    %cst_30 = arith.constant 1.191500e+00 : f32
    %57 = vector.broadcast %cst_30 : f32 to vector<32x8xf32>
    %58 = arith.mulf %57, %56 : vector<32x8xf32>
    %cst_31 = arith.constant 1.595700e+00 : f32
    %59 = vector.broadcast %cst_31 : f32 to vector<32x8xf32>
    %60 = arith.addf %58, %59 : vector<32x8xf32>
    %61 = arith.mulf %60, %56 : vector<32x8xf32>
    %cst_32 = arith.constant 5.000000e-01 : f32
    %62 = vector.broadcast %cst_32 : f32 to vector<32x8xf32>
    %63 = arith.addf %61, %62 : vector<32x8xf32>
    %64 = arith.mulf %63, %56 : vector<32x8xf32>
    %cst_33 = arith.constant 2.180000e-02 : f32
    %65 = vector.broadcast %cst_33 : f32 to vector<32x8xf32>
    %66 = arith.addf %64, %65 : vector<32x8xf32>
    %cst_34 = arith.constant 2.383000e+00 : f32
    %67 = vector.broadcast %cst_34 : f32 to vector<32x8xf32>
    %68 = arith.mulf %67, %56 : vector<32x8xf32>
    %69 = arith.mulf %68, %56 : vector<32x8xf32>
    %70 = math.absf %69 : vector<32x8xf32>
    %cst_35 = arith.constant 1.000000e+00 : f32
    %71 = vector.broadcast %cst_35 : f32 to vector<32x8xf32>
    %72 = arith.addf %71, %70 : vector<32x8xf32>
    %73 = tpu.reciprocal %72 {approx = true} : vector<32x8xf32> -> vector<32x8xf32>
    %74 = arith.mulf %66, %73 : vector<32x8xf32>
    %cst_36 = arith.constant dense<0.000000e+00> : vector<4x8xf32>
    %75 = tpu.matmul %5, %74, %cst_36 {dimension_numbers = #tpu.dot_dimension_numbers<[1], [0], [0], [1], [0, 0, 1, 1], [], []>, precision = #tpu.contract_precision<fp32>} : vector<4x32xf32>, vector<32x8xf32>, vector<4x8xf32> -> vector<4x8xf32>
    %76 = vector.broadcast %9 : vector<4x1xf32> to vector<4x8xf32>
    %77 = arith.addf %75, %76 : vector<4x8xf32>
    %c0_37 = arith.constant 0 : index
    %c0_38 = arith.constant 0 : index
    %c0_39 = arith.constant 0 : index
    %78 = vector.load %arg7[%c0_37, %c0_38, %c0_39] : memref<1x4x8xf32, #tpu.memory_space<vmem>>, vector<1x4x8xf32>
    %79 = vector.shape_cast %78 : vector<1x4x8xf32> to vector<4x8xf32>
    %80 = vector.shape_cast %77 : vector<4x8xf32> to vector<1x4x8xf32>
    tpu.vector_store %arg7[%c0_37, %c0_38, %c0_39], %80 {strides = array<i32>} : memref<1x4x8xf32, #tpu.memory_space<vmem>>, vector<1x4x8xf32>,
    return
  }
  func.func @transform_0(%arg0: i32, %arg1: i32) -> (i32, i32, i32) {
    %c0_i32 = arith.constant 0 : i32
    %c0_i32_0 = arith.constant 0 : i32
    return %arg0, %c0_i32, %arg1 : i32, i32, i32
  }
  func.func @transform_1(%arg0: i32, %arg1: i32) -> (i32, i32) {
    %c0_i32 = arith.constant 0 : i32
    %c0_i32_0 = arith.constant 0 : i32
    %c0_i32_1 = arith.constant 0 : i32
    return %c0_i32, %c0_i32_0 : i32, i32
  }
  func.func @transform_2(%arg0: i32, %arg1: i32) -> (i32, i32, i32) {
    %c0_i32 = arith.constant 0 : i32
    %c0_i32_0 = arith.constant 0 : i32
    %c0_i32_1 = arith.constant 0 : i32
    %c0_i32_2 = arith.constant 0 : i32
    return %c0_i32, %c0_i32_0, %c0_i32_1 : i32, i32, i32
  }
  func.func @transform_3(%arg0: i32, %arg1: i32) -> (i32, i32) {
    %c0_i32 = arith.constant 0 : i32
    %c0_i32_0 = arith.constant 0 : i32
    %c0_i32_1 = arith.constant 0 : i32
    return %c0_i32, %c0_i32_0 : i32, i32
  }
  func.func @transform_4(%arg0: i32, %arg1: i32) -> (i32, i32) {
    %c0_i32 = arith.constant 0 : i32
    %c0_i32_0 = arith.constant 0 : i32
    %c0_i32_1 = arith.constant 0 : i32
    return %c0_i32, %c0_i32_0 : i32, i32
  }
  func.func @transform_5(%arg0: i32, %arg1: i32) -> (i32, i32, i32) {
    %c0_i32 = arith.constant 0 : i32
    %c0_i32_0 = arith.constant 0 : i32
    return %arg0, %c0_i32, %arg1 : i32, i32, i32
  }
}

</mosaic_0001>

<bundles_post_ra>
// kernel: tpu_custom_call.1
= control target key start
LH: loop header
LB: loop body
LE: loop exit
PB: predicated region body
PF: predicated region fallthrough
CT: control target
= control target key end

     0   :  { %10 = vsyncpa [#allocation3], 0  ;;  %s4055_s0 = inlined_call_operand.vmem [shape: f32[2,4,8], index: 0, kind: input, shape index: {}]   ;;  %s4056_s1 = inlined_call_operand.vmem [shape: f32[32,4], index: 1, kind: input, shape index: {}]   ;;  %s4057_s2 = inlined_call_operand.vmem [shape: f32[2,32,32], index: 2, kind: input, shape index: {}]   ;;  %s4058_s3 = inlined_call_operand.vmem [shape: f32[4,32], index: 3, kind: input, shape index: {}]   ;;  %s4059_s4 = inlined_call_operand.vmem [shape: f32[100,1], index: 4, kind: input, shape index: {}]   ;;  %s4060_s5 = inlined_call_operand.hbm [shape: f32[2,4,8], index: 5, kind: output, shape index: {}]  }
   0x1   :  { %12 = vsyncpa [#allocation3 + $0x1], 0  ;;  %s3552_s18 = smov 0   ;;  %s3554_s19 = smov 0  }
   0x2   :  { %s3556_s20 = smov 0   ;;  %s3558_s21 = smov 0  }
   0x3   :  { %s3560_s22 = smov 0   ;;  %s3562_s23 = smov 0  }
   0x4 LB: > { %s2903_s24 = sadd.s32 4294967295, %s3516_s23   ;;  %s2904_s25 = sadd.s32 4294967294, %s3516_s23   ;;  %s3516_s23 = sphi %s3562_s23, %s18_s23   ;;  %s3512_s22 = sphi %s3560_s22, %s4067_s22   ;;  %s3508_s21 = sphi %s3558_s21, %s4066_s21   ;;  %s3504_s20 = sphi %s3556_s20, %s4065_s20   ;;  %s3500_s19 = sphi %s3554_s19, %s4064_s19   ;;  %s3496_s18 = sphi %s3552_s18, %s4063_s18  }
   0x5   : > { %s30_s26 = sadd.s32 1, %s3512_s22  ;;  %s151_s27 = sadd.s32 1, %s3504_s20 }
   0x6   : > { %p32_p0 = scmp.ge.s32.totalorder %s30_s26, 2  ;;  %p161_p1 = scmp.ne.s32.totalorder %s3504_s20, %s3500_s19 }
   0x7   : > { %p162_p2 = scmp.eq.s32.totalorder %s2903_s24, 1  ;;  %p167_p3 = scmp.ne.s32.totalorder %s3500_s19, %s3496_s18 }
   0x8   : > { %s4069_s26 = smov (%p32_p0, %s30_s26), 0  ;;  %p168_p5 = scmp.eq.s32.totalorder %s2904_s25, 1 }
   0x9   : > { %p3592_p4 = por %p162_p2, %p161_p1  ;;  %s146_s29 = ssub.s32 %s3512_s22, %s4069_s26 }
   0xa   : > { %p2907_p6 = scmp.ge.s32.totalorder %s3516_s23, 1  ;;  %p149_p7 = scmp.eq.s32.totalorder %s146_s29, 0 }
   0xb   : > { %p3599_p8 = por %p168_p5, %p167_p3  ;;  %p208_p9 = scmp.lt.s32.totalorder %s3516_s23, 3 }
   0xc   : > { %s3605_s6 = scalar_select %p149_p7, %s3504_s20, %s151_s27  }
   0xd   : > { %p209_p10 = pnand %p2907_p6, %p208_p9 }
   0xe   : > { %p238_p11 = scmp.lt.s32.totalorder (!%p209_p10), %s3508_s21, 1  ;;  %s235_s25 = sand.u32 (!%p209_p10), 1, %s3500_s19  }
   0xf   : > { %212 = sbr.rel (%p209_p10) target bundleno = 1050 (0x41a), region = 40  ;;  %s2915_s29 = sshll.u32 (!%p209_p10), %s3508_s21, 6 }
  0x10   : > { %s4015_s11 = scalar_lea.hbm (!%p209_p10), %s4060_s5, %s2915_s29  ;;  %s2818_s12 = scalar_lea.sflag (!%p209_p10), [#allocation3], %s235_s25 }
  0x14   : > { %v245_v0 = vld [vmem:[%s4056_s1] sm:$0xff]  ;;  %vm293_vm0 = vcmask 31744   ;;  %v246_v1 = vld [vmem:[%s4056_s1 + $0x8] sm:$0xff]  ;;  %v247_v2 = vld [vmem:[%s4056_s1 + $0x10] sm:$0xff]  ;;  %s239_s17 = scalar_select %p238_p11, %s3508_s21, 1  ;;  %v3518_v12 = vmov 0  }
  0x15   : > { %v295_v3 = vsel %vm293_vm0, %v245_v0, 0  ;;  %v298_v4 = vsel %vm293_vm0, %v246_v1, 0  ;;  %v301_v5 = vsel %vm293_vm0, %v247_v2, 0  ;;  %v248_v6 = vld [vmem:[%s4056_s1 + $0x18] sm:$0xff]  ;;  %3414 = vset.pattern.permute.xlu0 %v3518_v12  ;;  %3415 = vset.pattern.permute.xlu1 %v3518_v12  ;;  %v260_v14 = vld [vmem:[%s4059_s4 + $0x8] sm:$0xff]  ;;  %vm306_vm1 = vcmask 1043456  }
  0x16   : > { %v262_v7 = vld [vmem:[%s4059_s4 + $0x18] sm:$0xff]  ;;  %v3624_v8 = vand.u32 4294901760, %v295_v3  ;;  %v3626_v9 = vand.u32 4294901760, %v298_v4  ;;  %v3628_v10 = vand.u32 4294901760, %v301_v5  ;;  %v304_v11 = vsel %vm293_vm0, %v248_v6, 0  ;;  %s2909_s27 = sshll.u32 %s239_s17, 2  ;;  %280 = vperm.xlu1 %3415, %v260_v14  }
  0x17   : > { %v3630_v13 = vand.u32 4294901760, %v304_v11  ;;  %290 = vperm.xlu0 %3414, %v262_v7   ;;  %v261_v18 = vld [vmem:[%s4059_s4 + $0x10] sm:$0xff]  ;;  %s244_s10 = scalar_lea.vmem %s4055_s0, %s2909_s27  ;;  %v259_v20 = vld [vmem:[%s4059_s4] sm:$0xff]  ;;  %v266_v31 = vld [vmem:[%s4059_s4 + $0x38] sm:$0xff]  ;;  %vm953_vm2 = vcmask 261120   ;;  %vm3520_vm3 = vmmov 0  }
  0x18   : > { %v3636_v15 = vsub.f32 %v295_v3, %v3624_v8  ;;  %v3639_v16 = vsub.f32 %v298_v4, %v3626_v9  ;;  %v3642_v17 = vsub.f32 %v301_v5, %v3628_v10  ;;  %3084 = vmatprep.mubr.f32.mxu1 %v3624_v8  ;;  %v272_v21 = vld [vmem:[%s244_s10] sm:$0xf]  ;;  %v265_v37 = vld [vmem:[%s4059_s4 + $0x30] sm:$0xff]  ;;  %v264_v39 = vld [vmem:[%s4059_s4 + $0x28] sm:$0xff]  ;;  %s2908_s27 = sshll.u32 %s235_s25, 2  ;;  %vm2815_vm4 = vcmask 60416  }
  0x19   : > { %v3652_v19 = vsub.f32 %v304_v11, %v3630_v13  ;;  %v308_v25 = vsel %vm306_vm1, %v272_v21, 0  ;;  %v263_v42 = vld [vmem:[%s4059_s4 + $0x20] sm:$0xff]  ;;  %v270_v44 = vld [vmem:[%s4059_s4 + $0x58] sm:$0xff]  ;;  %v268_v45 = vld [vmem:[%s4059_s4 + $0x48] sm:$0xff]  ;;  %s237_s7 = scalar_lea.vmem [#allocation2], %s2908_s27  ;;  %s3521_s21 = smov [#allocation2]  }
  0x1a   : > { %v378_v22 = vand.u32 4294901760, %v3636_v15  ;;  %v388_v23 = vand.u32 4294901760, %v3639_v16  ;;  %v398_v24 = vand.u32 4294901760, %v3642_v17  ;;  %v341_v27 = vand.u32 4294901760, %v308_v25  ;;  %275 = vperm.xlu1 %3415, %v259_v20   ;;  %v269_v46 = vld [vmem:[%s4059_s4 + $0x50] sm:$0xff]  ;;  %v267_v48 = vld [vmem:[%s4059_s4 + $0x40] sm:$0xff] }
  0x1b   : > { %v408_v26 = vand.u32 4294901760, %v3652_v19  ;;  %285 = vperm.xlu0 %3414, %v261_v18   ;;  %v271_v47 = vld [vmem:[%s4059_s4 + $0x60] sm:$0xf]  ;;  %s2832_s8 = sshll.u32 %s237_s7, 4  ;;  %s3444_s14 = sshll.u32 %s3521_s21, 4  ;;  %s2833_s8 = int_to_ptr.vmem [resolvable:$true] %s2832_s8  ;;  %s3445_s14 = int_to_ptr.vmem [resolvable:$false] %s3444_s14 }
  0x1c   : > { %v379_v28 = vsub.f32 %v3636_v15, %v378_v22  ;;  %v389_v29 = vsub.f32 %v3639_v16, %v388_v23  ;;  %v399_v30 = vsub.f32 %v3642_v17, %v398_v24  ;;  %3074 = vmatprep.subr.mxu0 %v341_v27  ;;  %v448_v36 = vsub.f32 %v308_v25, %v341_v27  ;;  %v249_v49 = vld [vmem:[%s4057_s2] sm:$0xff]  ;;  %s3440_s13 = scalar_lea.vmem %s2833_s8, 64  ;;  %s3446_s15 = scalar_lea.vmem %s3445_s14, 128 }
  0x1d   : > { %v409_v32 = vsub.f32 %v3652_v19, %v408_v26  ;;  %3075 = vmatpush3.msra.mxu0 %v341_v27  ;;  %v955_v50 = vsel %vm953_vm2, %v249_v49, 0  ;;  %p3441_p12 = scmp.ne.s32.totalorder %s2833_s8, %s3440_s13  ;;  %p3447_p1 = scmp.lt.s32.totalorder %s2833_s8, %s3445_s14 }
  0x1e   : > { %v380_v33 = vand.u32 4294901760, %v379_v28  ;;  %v390_v34 = vand.u32 4294901760, %v389_v29  ;;  %v400_v35 = vand.u32 4294901760, %v399_v30  ;;  %v449_v38 = vand.u32 4294901760, %v448_v36  ;;  %3090 = vmatprep.subr.mxu0 %v448_v36  ;;  %945 = vperm.xlu1 %3415, %v265_v37   ;;  %p3448_p2 = scmp.lt.s32.totalorder %s3446_s15, %s3440_s13 }
  0x1f   : > { %950 = vperm.xlu0 %3414, %v266_v31   ;;  %v410_v40 = vand.u32 4294901760, %v409_v32  ;;  %v3711_v51 = vand.u32 4294901760, %v955_v50  ;;  %p3442_p13 = pnand %p3441_p12, %p3592_p4 }
  0x20   : > { %3076 = vmatprep.mubr.f32.mxu0 %v380_v33  ;;  %v450_v41 = vsub.f32 %v448_v36, %v449_v38  ;;  %p3449_p3 = por %p3448_p2, %p3447_p1 }
  0x21   : > { %3077 = vmatmul.mubr.f32.vlgmr.msra.gmra.mxu0 %v390_v34  ;;  %v3714_v52 = vsub.f32 %v955_v50, %v3711_v51  ;;  %p3443_p0 = pneg %p3442_p13 }
  0x22   : > { %3079 = vmatprep.mubr.f32.mxu0 %v400_v35  ;;  %3091 = vmatpush3.msra.mxu0 %v448_v36  ;;  %v451_v43 = vand.u32 4294901760, %v450_v41 }
  0x23   : > { %3106 = vmatprep.subr.mxu0 %v449_v38  ;;  %940 = vperm.xlu0 %3414, %v264_v39   ;;  %v1037_v53 = vand.u32 4294901760, %v3714_v52  ;;  %p3450_p5 = pnand %p3449_p3, %p3443_p0 }
  0x24   : > { %935 = vperm.xlu1 %3415, %v263_v42   ;;  %3082 = vmatprep.subr.mxu1 %v451_v43 }
  0x25   : > { %3080 = vmatmul.mubr.f32.gmra.mxu0 %v410_v40  ;;  %3083 = vmatpush3.msra.mxu1 %v451_v43  ;;  %v1038_v54 = vsub.f32 %v3714_v52, %v1037_v53 }
  0x26   : > { %3092 = vmatprep.mubr.f32.mxu0 %v3636_v15  ;;  %3085 = vmatmul.mubr.f32.vlgmr.msra.gmra.mxu1 %v3626_v9 }
  0x27   : > { %1645 = vperm.xlu0 %3414, %v270_v44   ;;  %3098 = vmatprep.subr.mxu1 %v341_v27  ;;  %v1039_v55 = vand.u32 4294901760, %v1038_v54 }
  0x28   : > { %3099 = vmatpush3.msra.mxu1 %v341_v27  ;;  %3087 = vmatprep.mubr.f32.mxu1 %v3628_v10 }
  0x29   : > { %3093 = vmatmul.mubr.f32.vlgmr.msra.gmra.mxu0 %v3639_v16  ;;  %3114 = vmatprep.subr.mxu1 %v341_v27 }
  0x2a   : > { %3095 = vmatprep.mubr.f32.mxu0 %v3642_v17  ;;  %3107 = vmatpush3.msra.mxu0 %v449_v38 }
  0x2b   : > { %3088 = vmatmul.mubr.f32.gmra.mxu1 %v3630_v13  ;;  %1635 = vperm.xlu0 %3414, %v268_v45  }
  0x2c   : > { %3100 = vmatprep.mubr.f32.mxu1 %v378_v22  ;;  %1640 = vperm.xlu1 %3415, %v269_v46  }
  0x2d   : > { %3096 = vmatmul.mubr.f32.gmra.mxu0 %v3652_v19 }
  0x2e   : > { %3108 = vmatprep.mubr.f32.mxu0 %v3624_v8 }
  0x2f   : > { %3101 = vmatmul.mubr.f32.vlgmr.msra.gmra.mxu1 %v388_v23  ;;  %2324 = vperm.xlu0 %3414, %v271_v47  }
  0x30   : > { %3115 = vmatpush3.msra.mxu1 %v341_v27  ;;  %3103 = vmatprep.mubr.f32.mxu1 %v398_v24 }
  0x31   : > { %3109 = vmatmul.mubr.f32.vlgmr.msra.gmra.mxu0 %v3626_v9  ;;  %1630 = vperm.xlu1 %3415, %v267_v48  }
  0x32   : > { %3111 = vmatprep.mubr.f32.mxu0 %v3628_v10 }
  0x33   : > { %3104 = vmatmul.mubr.f32.gmra.mxu1 %v408_v26 }
  0x34   : > { %3116 = vmatprep.mubr.f32.mxu1 %v3624_v8 }
  0x35   : > { %3112 = vmatmul.mubr.f32.gmra.mxu0 %v3630_v13 }
  0x36   : > { %3130 = vmatprep.mubr.f32.mxu0 %v1039_v55 }
  0x37   : > { %3117 = vmatmul.mubr.f32.vlgmr.msra.gmra.mxu1 %v3626_v9 }
  0x38   : > { %3119 = vmatprep.mubr.f32.mxu1 %v3628_v10 }
  0x3b   : > { %3120 = vmatmul.mubr.f32.gmra.mxu1 %v3630_v13 }
  0x3c   : > { %3144 = vmatprep.mubr.f32.mxu1 %v3711_v51 }
  0x91   : > { %v281_v59 = vpop.permute.xlu1 %280 }
  0x92   : > { %v291_v1 = vpop.permute.xlu0 %290 }
  0x95   : > { %v276_v3 = vpop.permute.xlu1 %275 }
  0x96   : > { %v286_v13 = vpop.permute.xlu0 %285 }
  0xe1   : > { %v3078_v56 = vpop.f32.mrf.mxu0 }
  0xe2   : > { %v393_v62 = vadd.f32 %v3078_v56, %v281_v59 }
  0xe3   : > { %v382_v57 = vpop.f32.mrf.mxu0 }
  0xe4   : > { %v383_v5 = vadd.f32 %v382_v57, %v276_v3 }
  0xe5   : > { %v3081_v58 = vpop.f32.mrf.mxu0 }
  0xe6   : > { %v3086_v61 = vpop.f32.mrf.mxu1  ;;  %v413_v8 = vadd.f32 %v3081_v58, %v291_v1 }
  0xe7   : > { %v402_v60 = vpop.f32.mrf.mxu0  ;;  %v495_v6 = vadd.f32 %v3086_v61, %v393_v62 }
  0xe8   : > { %v488_v0 = vpop.f32.mrf.mxu1  ;;  %v403_v16 = vadd.f32 %v402_v60, %v286_v13 }
  0xe9   : > { %v3094_v63 = vpop.f32.mrf.mxu0  ;;  %v489_v10 = vadd.f32 %v488_v0, %v383_v5 }
  0xea   : > { %v588_v14 = vadd.f32 %v3094_v63, %v495_v6 }
  0xeb   : > { %v580_v2 = vpop.f32.mrf.mxu0  ;;  %v3089_v4 = vpop.f32.mrf.mxu1 }
  0xec   : > { %v507_v17 = vadd.f32 %v3089_v4, %v413_v8  ;;  %v581_v19 = vadd.f32 %v580_v2, %v489_v10 }
  0xed   : > { %v3097_v7 = vpop.f32.mrf.mxu0  ;;  %v500_v9 = vpop.f32.mrf.mxu1 }
  0xee   : > { %v501_v22 = vadd.f32 %v500_v9, %v403_v16  ;;  %v602_v25 = vadd.f32 %v3097_v7, %v507_v17  ;;  %v251_v16 = vld [vmem:[%s4057_s2 + $0x10] sm:$0xff] }
  0xef   : > { %v594_v11 = vpop.f32.mrf.mxu0  ;;  %v3102_v12 = vpop.f32.mrf.mxu1 }
  0xf0   : > { %v684_v20 = vadd.f32 %v3102_v12, %v588_v14  ;;  %v595_v29 = vadd.f32 %v594_v11, %v501_v22  ;;  %v250_v11 = vld [vmem:[%s4057_s2 + $0x8] sm:$0xff]  ;;  %v961_v22 = vsel %vm953_vm2, %v251_v16, 0 }
  0xf1   : > { %v3110_v15 = vpop.f32.mrf.mxu0  ;;  %v675_v18 = vpop.f32.mrf.mxu1 }
  0xf2   : > { %v676_v24 = vadd.f32 %v675_v18, %v581_v19  ;;  %v780_v27 = vadd.f32 %v3110_v15, %v684_v20  ;;  %v958_v15 = vsel %vm953_vm2, %v250_v11, 0  ;;  %v252_v19 = vld [vmem:[%s4057_s2 + $0x18] sm:$0xff] }
  0xf3   : > { %v773_v21 = vpop.f32.mrf.mxu0  ;;  %v3105_v23 = vpop.f32.mrf.mxu1 }
  0xf4   : > { %v700_v30 = vadd.f32 %v3105_v23, %v602_v25  ;;  %v774_v32 = vadd.f32 %v773_v21, %v676_v24  ;;  %v3731_v21 = vand.u32 4294901760, %v958_v15 }
  0xf5   : > { %v691_v26 = vpop.f32.mrf.mxu1  ;;  %v3113_v28 = vpop.f32.mrf.mxu0 }
  0xf6   : > { %v692_v34 = vadd.f32 %v691_v26, %v595_v29  ;;  %v792_v40 = vadd.f32 %v3113_v28, %v700_v30  ;;  %v964_v26 = vsel %vm953_vm2, %v252_v19, 0  ;;  %v3735_v29 = vand.u32 4294901760, %v961_v22 }
  0xf7   : > { %v3118_v31 = vpop.f32.mrf.mxu1  ;;  %v785_v36 = vpop.f32.mrf.mxu0 }
  0xf8   : > { %v870_v33 = vadd.f32 %v3118_v31, %v780_v27  ;;  %v786_v45 = vadd.f32 %v785_v36, %v692_v34  ;;  %v3740_v34 = vand.u32 4294901760, %v964_v26 }
  0xf9   : > { %v863_v35 = vpop.f32.mrf.mxu1 }
  0xfa   : > { %v886_v37 = vmul.f32 1.1915, %v870_v33  ;;  %v910_v38 = vmul.f32 2.383, %v870_v33  ;;  %v864_v39 = vadd.f32 %v863_v35, %v774_v32  ;;  %v3738_v32 = vsub.f32 %v958_v15, %v3731_v21 }
  0xfb   : > { %v3121_v41 = vpop.f32.mrf.mxu1 }
  0xfc   : > { %v914_v42 = vmul.f32 %v910_v38, %v870_v33  ;;  %v885_v43 = vmul.f32 1.1915, %v864_v39  ;;  %v909_v44 = vmul.f32 2.383, %v864_v39  ;;  %v882_v46 = vadd.f32 %v3121_v41, %v792_v40 }
  0xfd   : > { %v875_v47 = vpop.f32.mrf.mxu1  ;;  %v890_v48 = vadd.f32 1.5957, %v886_v37  ;;  %v3745_v38 = vsub.f32 %v961_v22, %v3735_v29  ;;  %v1047_v41 = vand.u32 4294901760, %v3738_v32 }
  0xfe   : > { %v918_v49 = vand.u32 2147483647, %v914_v42  ;;  %v913_v50 = vmul.f32 %v909_v44, %v864_v39  ;;  %v888_v54 = vmul.f32 1.1915, %v882_v46  ;;  %v912_v55 = vmul.f32 2.383, %v882_v46 }
  0xff   : > { %v876_v56 = vadd.f32 %v875_v47, %v786_v45  ;;  %v889_v58 = vadd.f32 1.5957, %v885_v43  ;;  %v894_v63 = vmul.f32 %v890_v48, %v870_v33  ;;  %v3751_v44 = vsub.f32 %v964_v26, %v3740_v34 }
 0x100   : > { %v922_v57 = vadd.f32 1.0, %v918_v49  ;;  %v917_v59 = vand.u32 2147483647, %v913_v50  ;;  %v916_v60 = vmul.f32 %v912_v55, %v882_v46  ;;  %v892_v1 = vadd.f32 1.5957, %v888_v54 }
 0x101   : > { %v887_v61 = vmul.f32 1.1915, %v876_v56  ;;  %v911_v62 = vmul.f32 2.383, %v876_v56  ;;  %v893_v4 = vmul.f32 %v889_v58, %v864_v39  ;;  %v898_v8 = vadd.f32 0.5, %v894_v63 }
 0x102   : > { %3416 = vrcp.f32 %v922_v57  ;;  %v921_v0 = vadd.f32 1.0, %v917_v59  ;;  %v920_v2 = vand.u32 2147483647, %v916_v60  ;;  %v896_v9 = vmul.f32 %v892_v1, %v882_v46 }
 0x103   : > { %v915_v3 = vmul.f32 %v911_v62, %v876_v56  ;;  %v891_v6 = vadd.f32 1.5957, %v887_v61  ;;  %v897_v12 = vadd.f32 0.5, %v893_v4  ;;  %v902_v14 = vmul.f32 %v898_v8, %v870_v33 }
 0x104   : > { %3418 = vrcp.f32 %v921_v0  ;;  %v924_v5 = vadd.f32 1.0, %v920_v2  ;;  %v900_v17 = vadd.f32 0.5, %v896_v9  ;;  %v1057_v47 = vand.u32 4294901760, %v3745_v38 }
 0x105   : > { %v919_v7 = vand.u32 2147483647, %v915_v3  ;;  %v895_v13 = vmul.f32 %v891_v6, %v876_v56  ;;  %v901_v18 = vmul.f32 %v897_v12, %v864_v39  ;;  %v906_v23 = vadd.f32 0.0218, %v902_v14 }
 0x106   : > { %3420 = vrcp.f32 %v924_v5  ;;  %v904_v25 = vmul.f32 %v900_v17, %v882_v46  ;;  %v1048_v50 = vsub.f32 %v3738_v32, %v1047_v41  ;;  %v1067_v55 = vand.u32 4294901760, %v3751_v44 }
 0x107   : > { %v923_v10 = vadd.f32 1.0, %v919_v7  ;;  %v899_v20 = vadd.f32 0.5, %v895_v13  ;;  %v905_v28 = vadd.f32 0.0218, %v901_v18  ;;  %v1058_v59 = vsub.f32 %v3745_v38, %v1057_v47 }
 0x108   : > { %v908_v35 = vadd.f32 0.0218, %v904_v25  ;;  %v1049_v61 = vand.u32 4294901760, %v1048_v50  ;;  %v1068_v0 = vsub.f32 %v3751_v44, %v1067_v55 }
 0x109   : > { %3422 = vrcp.f32 %v923_v10  ;;  %v903_v31 = vmul.f32 %v899_v20, %v876_v56  ;;  %v1059_v4 = vand.u32 4294901760, %v1058_v59  ;;  %v951_v20 = vpop.permute.xlu0 %950 }
 0x10a   : > { %v1069_v7 = vand.u32 4294901760, %v1068_v0 }
 0x10b   : > { %v907_v40 = vadd.f32 0.0218, %v903_v31 }
 0x10d   : > { %v941_v26 = vpop.permute.xlu0 %940 }
 0x10f   : > { %v3417_v24 = vpop.eup %3416 }
 0x110   : > { %v930_v27 = vmul.f32 %v3417_v24, %v906_v23  ;;  %v946_v23 = vpop.permute.xlu1 %945 }
 0x111   : > { %v3419_v30 = vpop.eup %3418 }
 0x112   : > { %v929_v33 = vmul.f32 %v3419_v30, %v905_v28  ;;  %v3742_v37 = vand.u32 4294901760, %v930_v27 }
 0x113   : > { %v3421_v36 = vpop.eup %3420 }
 0x114   : > { %v932_v39 = vmul.f32 %v3421_v36, %v908_v35  ;;  %v3748_v43 = vand.u32 4294901760, %v929_v33  ;;  %v1115_v48 = vsub.f32 %v930_v27, %v3742_v37 }
 0x116   : > { %v3423_v42 = vpop.eup %3422  ;;  %v3753_v45 = vand.u32 4294901760, %v932_v39  ;;  %v1122_v56 = vsub.f32 %v929_v33, %v3748_v43  ;;  %v1116_v60 = vand.u32 4294901760, %v1115_v48 }
 0x117   : > { %v931_v46 = vmul.f32 %v3423_v42, %v907_v40 }
 0x118   : > { %3122 = vmatprep.subr.mxu0 %v3753_v45  ;;  %v1101_v54 = vsub.f32 %v932_v39, %v3753_v45  ;;  %v1123_v1 = vand.u32 4294901760, %v1122_v56  ;;  %v1117_v5 = vsub.f32 %v1115_v48, %v1116_v60 }
 0x119   : > { %v3757_v49 = vand.u32 4294901760, %v931_v46  ;;  %3123 = vmatpush3.msra.mxu0 %v3753_v45 }
 0x11a   : > { %v1102_v57 = vand.u32 4294901760, %v1101_v54  ;;  %v1124_v8 = vsub.f32 %v1122_v56, %v1123_v1  ;;  %v1118_v9 = vand.u32 4294901760, %v1117_v5 }
 0x11b   : > { %3124 = vmatprep.subr.mxu0 %v3757_v49  ;;  %v1108_v58 = vsub.f32 %v931_v46, %v3757_v49 }
 0x11c   : > { %3125 = vmatpush3.msra.mxu0 %v3757_v49  ;;  %v1103_v62 = vsub.f32 %v1101_v54, %v1102_v57  ;;  %v1125_v10 = vand.u32 4294901760, %v1124_v8 }
 0x11d   : > { %3126 = vmatprep.subr.mxu0 %v3742_v37  ;;  %v1109_v63 = vand.u32 4294901760, %v1108_v58 }
 0x11e   : > { %3127 = vmatpush3.msra.mxu0 %v3742_v37  ;;  %v1104_v2 = vand.u32 4294901760, %v1103_v62 }
 0x11f   : > { %3128 = vmatprep.subr.mxu0 %v3748_v43  ;;  %v1110_v3 = vsub.f32 %v1108_v58, %v1109_v63 }
 0x120   : > { %3129 = vmatpush3.msra.mxu0 %v3748_v43  ;;  %3136 = vmatprep.subr.mxu1 %v1104_v2 }
 0x121   : > { %3131 = vmatmul.mubr.f32.vlgmr.msra.gmra.mxu0 %v1049_v61  ;;  %v1111_v6 = vand.u32 4294901760, %v1110_v3  ;;  %3150 = vmatprep.subr.mxu0 %v1101_v54 }
 0x122   : > { %3137 = vmatpush3.msra.mxu1 %v1104_v2  ;;  %3151 = vmatpush3.msra.mxu0 %v1101_v54 }
 0x123   : > { %3138 = vmatprep.subr.mxu1 %v1111_v6  ;;  %3152 = vmatprep.subr.mxu0 %v1108_v58 }
 0x124   : > { %3133 = vmatprep.mubr.f32.mxu0 %v1059_v4  ;;  %3139 = vmatpush3.msra.mxu1 %v1111_v6 }
 0x125   : > { %3153 = vmatpush3.msra.mxu0 %v1108_v58  ;;  %3140 = vmatprep.subr.mxu1 %v1118_v9 }
 0x126   : > { %3134 = vmatmul.mubr.f32.gmra.mxu0 %v1069_v7  ;;  %3154 = vmatprep.subr.mxu0 %v1115_v48 }
 0x127   : > { %3141 = vmatpush3.msra.mxu1 %v1118_v9  ;;  %3155 = vmatpush3.msra.mxu0 %v1115_v48 }
 0x128   : > { %3142 = vmatprep.subr.mxu1 %v1125_v10  ;;  %3156 = vmatprep.subr.mxu0 %v1122_v56 }
 0x129   : > { %3143 = vmatpush3.msra.mxu1 %v1125_v10  ;;  %3157 = vmatpush3.msra.mxu0 %v1122_v56 }
 0x12a   : > { %3145 = vmatmul.mubr.f32.vlgmr.msra.gmra.mxu1 %v3731_v21  ;;  %3158 = vmatprep.mubr.f32.mxu0 %v3714_v52  ;;  %v2910_v52 = vld [vmem:[%s4057_s2 + $0x20] sm:$0xff] }
 0x12b   : > { %3164 = vmatprep.subr.mxu1 %v3753_v45  ;;  %3178 = vmatprep.subr.mxu0 %v1102_v57 }
 0x12c   : > { %3159 = vmatmul.mubr.f32.vlgmr.msra.gmra.mxu0 %v3738_v32  ;;  %3165 = vmatpush3.msra.mxu1 %v3753_v45 }
 0x12d   : > { %3179 = vmatpush3.msra.mxu0 %v1102_v57  ;;  %3166 = vmatprep.subr.mxu1 %v3757_v49 }
 0x12e   : > { %3180 = vmatprep.subr.mxu0 %v1109_v63  ;;  %3147 = vmatprep.mubr.f32.mxu1 %v3735_v29 }
 0x12f   : > { %3167 = vmatpush3.msra.mxu1 %v3757_v49  ;;  %3181 = vmatpush3.msra.mxu0 %v1109_v63 }
 0x130   : > { %3148 = vmatmul.mubr.f32.gmra.mxu1 %v3740_v34  ;;  %3168 = vmatprep.subr.mxu1 %v3742_v37 }
 0x131   : > { %3182 = vmatprep.subr.mxu0 %v1116_v60  ;;  %3161 = vmatprep.mubr.f32.mxu0 %v3745_v38 }
 0x132   : > { %3169 = vmatpush3.msra.mxu1 %v3742_v37  ;;  %3183 = vmatpush3.msra.mxu0 %v1116_v60 }
 0x133   : > { %3170 = vmatprep.subr.mxu1 %v3748_v43  ;;  %3162 = vmatmul.mubr.f32.gmra.mxu0 %v3751_v44 }
 0x134   : > { %3184 = vmatprep.subr.mxu0 %v1123_v1  ;;  %3171 = vmatpush3.msra.mxu1 %v3748_v43 }
 0x135   : > { %3172 = vmatprep.mubr.f32.mxu1 %v1037_v53  ;;  %3185 = vmatpush3.msra.mxu0 %v1123_v1  ;;  %v1649_v53 = vsel %vm953_vm2, %v2910_v52, 0 }
 0x136   : > { %3173 = vmatmul.mubr.f32.vlgmr.msra.gmra.mxu1 %v1047_v41  ;;  %3192 = vmatprep.subr.mxu1 %v3753_v45  ;;  %v3823_v11 = vand.u32 4294901760, %v1649_v53 }
 0x137   : > { %3186 = vmatprep.mubr.f32.mxu0 %v3711_v51  ;;  %3193 = vmatpush3.msra.mxu1 %v3753_v45 }
 0x138   : > { %3187 = vmatmul.mubr.f32.vlgmr.msra.gmra.mxu0 %v3731_v21  ;;  %3194 = vmatprep.subr.mxu1 %v3757_v49  ;;  %v3826_v12 = vsub.f32 %v1649_v53, %v3823_v11 }
 0x139   : > { %3175 = vmatprep.mubr.f32.mxu1 %v1057_v47  ;;  %3195 = vmatpush3.msra.mxu1 %v3757_v49 }
 0x13a   : > { %3189 = vmatprep.mubr.f32.mxu0 %v3735_v29  ;;  %3176 = vmatmul.mubr.f32.gmra.mxu1 %v1067_v55 }
 0x13b   : > { %3196 = vmatprep.subr.mxu1 %v3742_v37  ;;  %3200 = vmatprep.mubr.f32.mxu1 %v3711_v51  ;;  %v1731_v51 = vand.u32 4294901760, %v3826_v12 }
 0x13c   : > { %3197 = vmatpush3.msra.mxu1 %v3742_v37  ;;  %3190 = vmatmul.mubr.f32.gmra.mxu0 %v3740_v34 }
 0x13d   : > { %3198 = vmatprep.subr.mxu1 %v3748_v43  ;;  %v1732_v13 = vsub.f32 %v3826_v12, %v1731_v51 }
 0x13e   : > { %3199 = vmatpush3.msra.mxu1 %v3748_v43 }
 0x13f   : > { %3201 = vmatmul.mubr.f32.vlgmr.msra.gmra.mxu1 %v3731_v21  ;;  %v1733_v14 = vand.u32 4294901760, %v1732_v13 }
 0x140   : > { %3203 = vmatprep.mubr.f32.mxu1 %v3735_v29  ;;  %v936_v29 = vpop.permute.xlu1 %935 }
 0x141   : > { %3214 = vmatprep.mubr.f32.mxu0 %v1733_v14 }
 0x143   : > { %3204 = vmatmul.mubr.f32.gmra.mxu1 %v3740_v34 }
 0x144   : > { %3228 = vmatprep.mubr.f32.mxu1 %v3823_v11 }
 0x1e1   : > { %v3132_v15 = vpop.f32.mrf.mxu0 }
 0x1e2   : > { %v1052_v27 = vadd.f32 %v3132_v15, %v941_v26 }
 0x1e3   : > { %v1041_v16 = vpop.f32.mrf.mxu0 }
 0x1e4   : > { %v1042_v30 = vadd.f32 %v1041_v16, %v936_v29 }
 0x1e6   : > { %v3135_v17 = vpop.f32.mrf.mxu0 }
 0x1e7   : > { %v1072_v36 = vadd.f32 %v3135_v17, %v951_v20 }
 0x1e8   : > { %v1061_v18 = vpop.f32.mrf.mxu0 }
 0x1e9   : > { %v1062_v40 = vadd.f32 %v1061_v18, %v946_v23 }
 0x1ea   : > { %v3146_v19 = vpop.f32.mrf.mxu1 }
 0x1eb   : > { %v1169_v31 = vadd.f32 %v3146_v19, %v1052_v27 }
 0x1ec   : > { %v1162_v21 = vpop.f32.mrf.mxu1  ;;  %v3160_v22 = vpop.f32.mrf.mxu0 }
 0x1ed   : > { %v1163_v33 = vadd.f32 %v1162_v21, %v1042_v30  ;;  %v1268_v37 = vadd.f32 %v3160_v22, %v1169_v31 }
 0x1ee   : > { %v1260_v25 = vpop.f32.mrf.mxu0 }
 0x1ef   : > { %v1261_v42 = vadd.f32 %v1260_v25, %v1163_v33 }
 0x1f0   : > { %v3149_v24 = vpop.f32.mrf.mxu1 }
 0x1f1   : > { %v1181_v41 = vadd.f32 %v3149_v24, %v1072_v36 }
 0x1f2   : > { %v1174_v28 = vpop.f32.mrf.mxu1 }
 0x1f3   : > { %v3163_v32 = vpop.f32.mrf.mxu0  ;;  %v1175_v45 = vadd.f32 %v1174_v28, %v1062_v40 }
 0x1f4   : > { %v1282_v48 = vadd.f32 %v3163_v32, %v1181_v41 }
 0x1f5   : > { %v1274_v34 = vpop.f32.mrf.mxu0 }
 0x1f6   : > { %v3174_v35 = vpop.f32.mrf.mxu1  ;;  %v1275_v55 = vadd.f32 %v1274_v34, %v1175_v45  ;;  %v2911_v34 = vld [vmem:[%s4057_s2 + $0x28] sm:$0xff] }
 0x1f7   : > { %v1367_v43 = vadd.f32 %v3174_v35, %v1268_v37 }
 0x1f8   : > { %v1358_v38 = vpop.f32.mrf.mxu1  ;;  %v3188_v39 = vpop.f32.mrf.mxu0 }
 0x1f9   : > { %v1359_v47 = vadd.f32 %v1358_v38, %v1261_v42  ;;  %v1472_v50 = vadd.f32 %v3188_v39, %v1367_v43  ;;  %v1652_v38 = vsel %vm953_vm2, %v2911_v34, 0  ;;  %v2912_v39 = vld [vmem:[%s4057_s2 + $0x30] sm:$0xff]  ;;  %v2913_v42 = vld [vmem:[%s4057_s2 + $0x38] sm:$0xff] }
 0x1fa   : > { %v1465_v44 = vpop.f32.mrf.mxu0  ;;  %v3177_v46 = vpop.f32.mrf.mxu1  ;;  %v1655_v45 = vsel %vm953_vm2, %v2912_v39, 0 }
 0x1fb   : > { %v1383_v56 = vadd.f32 %v3177_v46, %v1282_v48  ;;  %v1466_v58 = vadd.f32 %v1465_v44, %v1359_v47  ;;  %v3843_v44 = vand.u32 4294901760, %v1652_v38 }
 0x1fc   : > { %v1374_v49 = vpop.f32.mrf.mxu1  ;;  %v3191_v54 = vpop.f32.mrf.mxu0 }
 0x1fd   : > { %v1375_v60 = vadd.f32 %v1374_v49, %v1275_v55  ;;  %v1484_v2 = vadd.f32 %v3191_v54, %v1383_v56  ;;  %v1658_v49 = vsel %vm953_vm2, %v2913_v42, 0  ;;  %v3847_v55 = vand.u32 4294901760, %v1655_v45 }
 0x1fe   : > { %v1477_v62 = vpop.f32.mrf.mxu0 }
 0x1ff   : > { %v3202_v57 = vpop.f32.mrf.mxu1  ;;  %v1478_v7 = vadd.f32 %v1477_v62, %v1375_v60  ;;  %v3852_v60 = vand.u32 4294901760, %v1658_v49 }
 0x200   : > { %v1565_v59 = vadd.f32 %v3202_v57, %v1472_v50 }
 0x201   : > { %v1558_v61 = vpop.f32.mrf.mxu1 }
 0x202   : > { %v1581_v63 = vmul.f32 1.1915, %v1565_v59  ;;  %v1605_v0 = vmul.f32 2.383, %v1565_v59  ;;  %v1559_v1 = vadd.f32 %v1558_v61, %v1466_v58  ;;  %v3850_v58 = vsub.f32 %v1652_v38, %v3843_v44 }
 0x203   : > { %v3205_v3 = vpop.f32.mrf.mxu1 }
 0x204   : > { %v1609_v4 = vmul.f32 %v1605_v0, %v1565_v59  ;;  %v1580_v5 = vmul.f32 1.1915, %v1559_v1  ;;  %v1604_v6 = vmul.f32 2.383, %v1559_v1  ;;  %v1577_v8 = vadd.f32 %v3205_v3, %v1484_v2 }
 0x205   : > { %v1570_v9 = vpop.f32.mrf.mxu1  ;;  %v1585_v10 = vadd.f32 1.5957, %v1581_v63  ;;  %v3857_v0 = vsub.f32 %v1655_v45, %v3847_v55  ;;  %v1741_v3 = vand.u32 4294901760, %v3850_v58 }
 0x206   : > { %v1613_v52 = vand.u32 2147483647, %v1609_v4  ;;  %v1608_v53 = vmul.f32 %v1604_v6, %v1559_v1  ;;  %v1583_v13 = vmul.f32 1.1915, %v1577_v8  ;;  %v1607_v14 = vmul.f32 2.383, %v1577_v8 }
 0x207   : > { %v1571_v15 = vadd.f32 %v1570_v9, %v1478_v7  ;;  %v1584_v17 = vadd.f32 1.5957, %v1580_v5  ;;  %v1589_v22 = vmul.f32 %v1585_v10, %v1565_v59  ;;  %v3863_v6 = vsub.f32 %v1658_v49, %v3852_v60 }
 0x208   : > { %v1617_v16 = vadd.f32 1.0, %v1613_v52  ;;  %v1612_v18 = vand.u32 2147483647, %v1608_v53  ;;  %v1611_v19 = vmul.f32 %v1607_v14, %v1577_v8  ;;  %v1587_v24 = vadd.f32 1.5957, %v1583_v13 }
 0x209   : > { %v1582_v20 = vmul.f32 1.1915, %v1571_v15  ;;  %v1606_v21 = vmul.f32 2.383, %v1571_v15  ;;  %v1588_v27 = vmul.f32 %v1584_v17, %v1559_v1  ;;  %v1593_v31 = vadd.f32 0.5, %v1589_v22 }
 0x20a   : > { %3424 = vrcp.f32 %v1617_v16  ;;  %v1616_v23 = vadd.f32 1.0, %v1612_v18  ;;  %v1615_v25 = vand.u32 2147483647, %v1611_v19  ;;  %v1591_v32 = vmul.f32 %v1587_v24, %v1577_v8 }
 0x20b   : > { %v1610_v26 = vmul.f32 %v1606_v21, %v1571_v15  ;;  %v1586_v29 = vadd.f32 1.5957, %v1582_v20  ;;  %v1592_v35 = vadd.f32 0.5, %v1588_v27  ;;  %v1597_v37 = vmul.f32 %v1593_v31, %v1565_v59 }
 0x20c   : > { %3426 = vrcp.f32 %v1616_v23  ;;  %v1619_v28 = vadd.f32 1.0, %v1615_v25  ;;  %v1595_v40 = vadd.f32 0.5, %v1591_v32  ;;  %v1751_v9 = vand.u32 4294901760, %v3857_v0 }
 0x20d   : > { %v1614_v30 = vand.u32 2147483647, %v1610_v26  ;;  %v1590_v36 = vmul.f32 %v1586_v29, %v1571_v15  ;;  %v1596_v41 = vmul.f32 %v1592_v35, %v1559_v1  ;;  %v1601_v46 = vadd.f32 0.0218, %v1597_v37  ;;  %v1646_v37 = vpop.permute.xlu0 %1645 }
 0x20e   : > { %3428 = vrcp.f32 %v1619_v28  ;;  %v1599_v48 = vmul.f32 %v1595_v40, %v1577_v8  ;;  %v1742_v53 = vsub.f32 %v3850_v58, %v1741_v3  ;;  %v1761_v14 = vand.u32 4294901760, %v3863_v6  ;;  %v1641_v40 = vpop.permute.xlu1 %1640 }
 0x20f   : > { %v1618_v33 = vadd.f32 1.0, %v1614_v30  ;;  %v1594_v43 = vadd.f32 0.5, %v1590_v36  ;;  %v1600_v54 = vadd.f32 0.0218, %v1596_v41  ;;  %v1752_v18 = vsub.f32 %v3857_v0, %v1751_v9 }
 0x210   : > { %v1603_v61 = vadd.f32 0.0218, %v1599_v48  ;;  %v1743_v20 = vand.u32 4294901760, %v1742_v53  ;;  %v1762_v23 = vsub.f32 %v3863_v6, %v1761_v14 }
 0x211   : > { %3430 = vrcp.f32 %v1618_v33  ;;  %v1598_v57 = vmul.f32 %v1594_v43, %v1571_v15  ;;  %v1753_v27 = vand.u32 4294901760, %v1752_v18  ;;  %v1636_v43 = vpop.permute.xlu0 %1635 }
 0x212   : > { %v1763_v30 = vand.u32 4294901760, %v1762_v23 }
 0x213   : > { %v1602_v2 = vadd.f32 0.0218, %v1598_v57 }
 0x217   : > { %v3425_v47 = vpop.eup %3424 }
 0x218   : > { %v1625_v50 = vmul.f32 %v3425_v47, %v1601_v46  ;;  %v1631_v46 = vpop.permute.xlu1 %1630 }
 0x219   : > { %v3427_v56 = vpop.eup %3426 }
 0x21a   : > { %v1624_v59 = vmul.f32 %v3427_v56, %v1600_v54  ;;  %v3854_v63 = vand.u32 4294901760, %v1625_v50 }
 0x21b   : > { %v3429_v62 = vpop.eup %3428 }
 0x21c   : > { %v1627_v1 = vmul.f32 %v3429_v62, %v1603_v61  ;;  %v3860_v5 = vand.u32 4294901760, %v1624_v59  ;;  %v1809_v10 = vsub.f32 %v1625_v50, %v3854_v63 }
 0x21e   : > { %v3431_v4 = vpop.eup %3430  ;;  %v3865_v7 = vand.u32 4294901760, %v1627_v1  ;;  %v1816_v15 = vsub.f32 %v1624_v59, %v3860_v5  ;;  %v1810_v19 = vand.u32 4294901760, %v1809_v10 }
 0x21f   : > { %v1626_v8 = vmul.f32 %v3431_v4, %v1602_v2 }
 0x220   : > { %3206 = vmatprep.subr.mxu0 %v3865_v7  ;;  %v1795_v13 = vsub.f32 %v1627_v1, %v3865_v7  ;;  %v1817_v24 = vand.u32 4294901760, %v1816_v15  ;;  %v1811_v28 = vsub.f32 %v1809_v10, %v1810_v19 }
 0x221   : > { %v3869_v52 = vand.u32 4294901760, %v1626_v8  ;;  %3207 = vmatpush3.msra.mxu0 %v3865_v7 }
 0x222   : > { %v1796_v16 = vand.u32 4294901760, %v1795_v13  ;;  %v1818_v31 = vsub.f32 %v1816_v15, %v1817_v24  ;;  %v1812_v32 = vand.u32 4294901760, %v1811_v28 }
 0x223   : > { %3208 = vmatprep.subr.mxu0 %v3869_v52  ;;  %v1802_v17 = vsub.f32 %v1626_v8, %v3869_v52 }
 0x224   : > { %3209 = vmatpush3.msra.mxu0 %v3869_v52  ;;  %v1797_v21 = vsub.f32 %v1795_v13, %v1796_v16  ;;  %v1819_v33 = vand.u32 4294901760, %v1818_v31 }
 0x225   : > { %3210 = vmatprep.subr.mxu0 %v3854_v63  ;;  %v1803_v22 = vand.u32 4294901760, %v1802_v17 }
 0x226   : > { %3211 = vmatpush3.msra.mxu0 %v3854_v63  ;;  %v1798_v25 = vand.u32 4294901760, %v1797_v21 }
 0x227   : > { %3212 = vmatprep.subr.mxu0 %v3860_v5  ;;  %v1804_v26 = vsub.f32 %v1802_v17, %v1803_v22 }
 0x228   : > { %3213 = vmatpush3.msra.mxu0 %v3860_v5  ;;  %3220 = vmatprep.subr.mxu1 %v1798_v25 }
 0x229   : > { %3215 = vmatmul.mubr.f32.vlgmr.msra.gmra.mxu0 %v1743_v20  ;;  %v1805_v29 = vand.u32 4294901760, %v1804_v26  ;;  %3234 = vmatprep.subr.mxu0 %v1795_v13 }
 0x22a   : > { %3221 = vmatpush3.msra.mxu1 %v1798_v25  ;;  %3235 = vmatpush3.msra.mxu0 %v1795_v13 }
 0x22b   : > { %3222 = vmatprep.subr.mxu1 %v1805_v29  ;;  %3236 = vmatprep.subr.mxu0 %v1802_v17 }
 0x22c   : > { %3217 = vmatprep.mubr.f32.mxu0 %v1753_v27  ;;  %3223 = vmatpush3.msra.mxu1 %v1805_v29 }
 0x22d   : > { %3237 = vmatpush3.msra.mxu0 %v1802_v17  ;;  %3224 = vmatprep.subr.mxu1 %v1812_v32 }
 0x22e   : > { %3218 = vmatmul.mubr.f32.gmra.mxu0 %v1763_v30  ;;  %3238 = vmatprep.subr.mxu0 %v1809_v10 }
 0x22f   : > { %3225 = vmatpush3.msra.mxu1 %v1812_v32  ;;  %3239 = vmatpush3.msra.mxu0 %v1809_v10 }
 0x230   : > { %3226 = vmatprep.subr.mxu1 %v1819_v33  ;;  %3240 = vmatprep.subr.mxu0 %v1816_v15 }
 0x231   : > { %3227 = vmatpush3.msra.mxu1 %v1819_v33  ;;  %3241 = vmatpush3.msra.mxu0 %v1816_v15 }
 0x232   : > { %3229 = vmatmul.mubr.f32.vlgmr.msra.gmra.mxu1 %v3843_v44  ;;  %3242 = vmatprep.mubr.f32.mxu0 %v3826_v12  ;;  %v3519_v12 = vmov 0.0  }
 0x233   : > { %3248 = vmatprep.subr.mxu1 %v3865_v7  ;;  %3262 = vmatprep.subr.mxu0 %v1796_v16 }
 0x234   : > { %3243 = vmatmul.mubr.f32.vlgmr.msra.gmra.mxu0 %v3850_v58  ;;  %3249 = vmatpush3.msra.mxu1 %v3865_v7 }
 0x235   : > { %3263 = vmatpush3.msra.mxu0 %v1796_v16  ;;  %3250 = vmatprep.subr.mxu1 %v3869_v52 }
 0x236   : > { %3264 = vmatprep.subr.mxu0 %v1803_v22  ;;  %3231 = vmatprep.mubr.f32.mxu1 %v3847_v55 }
 0x237   : > { %3251 = vmatpush3.msra.mxu1 %v3869_v52  ;;  %3265 = vmatpush3.msra.mxu0 %v1803_v22 }
 0x238   : > { %3232 = vmatmul.mubr.f32.gmra.mxu1 %v3852_v60  ;;  %3252 = vmatprep.subr.mxu1 %v3854_v63 }
 0x239   : > { %3266 = vmatprep.subr.mxu0 %v1810_v19  ;;  %3245 = vmatprep.mubr.f32.mxu0 %v3857_v0 }
 0x23a   : > { %3253 = vmatpush3.msra.mxu1 %v3854_v63  ;;  %3267 = vmatpush3.msra.mxu0 %v1810_v19 }
 0x23b   : > { %3254 = vmatprep.subr.mxu1 %v3860_v5  ;;  %3246 = vmatmul.mubr.f32.gmra.mxu0 %v3863_v6 }
 0x23c   : > { %3268 = vmatprep.subr.mxu0 %v1817_v24  ;;  %3255 = vmatpush3.msra.mxu1 %v3860_v5 }
 0x23d   : > { %3256 = vmatprep.mubr.f32.mxu1 %v1731_v51  ;;  %3269 = vmatpush3.msra.mxu0 %v1817_v24 }
 0x23e   : > { %3257 = vmatmul.mubr.f32.vlgmr.msra.gmra.mxu1 %v1741_v3  ;;  %3276 = vmatprep.subr.mxu1 %v3865_v7 }
 0x23f   : > { %3270 = vmatprep.mubr.f32.mxu0 %v3823_v11  ;;  %3277 = vmatpush3.msra.mxu1 %v3865_v7 }
 0x240   : > { %3271 = vmatmul.mubr.f32.vlgmr.msra.gmra.mxu0 %v3843_v44  ;;  %3278 = vmatprep.subr.mxu1 %v3869_v52 }
 0x241   : > { %3259 = vmatprep.mubr.f32.mxu1 %v1751_v9  ;;  %3279 = vmatpush3.msra.mxu1 %v3869_v52 }
 0x242   : > { %3273 = vmatprep.mubr.f32.mxu0 %v3847_v55  ;;  %3260 = vmatmul.mubr.f32.gmra.mxu1 %v1761_v14 }
 0x243   : > { %3280 = vmatprep.subr.mxu1 %v3854_v63  ;;  %3284 = vmatprep.mubr.f32.mxu1 %v3823_v11 }
 0x244   : > { %3281 = vmatpush3.msra.mxu1 %v3854_v63  ;;  %3274 = vmatmul.mubr.f32.gmra.mxu0 %v3852_v60 }
 0x245   : > { %3282 = vmatprep.subr.mxu1 %v3860_v5  ;;  %3290 = vmatprep.subr.mxu0 %v3519_v12 }
 0x246   : > { %3283 = vmatpush3.msra.mxu1 %v3860_v5  ;;  %3298 = vmatprep.mubr.msk.f32.mxu0 %vm3520_vm3, %v3519_v12 }
 0x247   : > { %3285 = vmatmul.mubr.f32.vlgmr.msra.gmra.mxu1 %v3843_v44  ;;  %3301 = vmatprep.subr.mxu1 %v3519_v12 }
 0x248   : > { %3287 = vmatprep.mubr.f32.mxu1 %v3847_v55 }
 0x24b   : > { %3288 = vmatmul.mubr.f32.gmra.mxu1 %v3852_v60 }
 0x24c   : > { %3309 = vmatprep.mubr.msk.f32.mxu1 %vm3520_vm3, %v3519_v12 }
 0x2e9   : > { %v3216_v11 = vpop.f32.mrf.mxu0 }
 0x2ea   : > { %v1746_v44 = vadd.f32 %v3216_v11, %v1636_v43 }
 0x2eb   : > { %v1735_v51 = vpop.f32.mrf.mxu0 }
 0x2ec   : > { %v1736_v47 = vadd.f32 %v1735_v51, %v1631_v46 }
 0x2ee   : > { %v3219_v34 = vpop.f32.mrf.mxu0 }
 0x2ef   : > { %v1766_v56 = vadd.f32 %v3219_v34, %v1646_v37 }
 0x2f0   : > { %v1755_v35 = vpop.f32.mrf.mxu0 }
 0x2f1   : > { %v1756_v60 = vadd.f32 %v1755_v35, %v1641_v40 }
 0x2f2   : > { %v3230_v36 = vpop.f32.mrf.mxu1 }
 0x2f3   : > { %v1863_v48 = vadd.f32 %v3230_v36, %v1746_v44 }
 0x2f4   : > { %v1856_v38 = vpop.f32.mrf.mxu1  ;;  %v3244_v39 = vpop.f32.mrf.mxu0 }
 0x2f5   : > { %v1857_v50 = vadd.f32 %v1856_v38, %v1736_v47  ;;  %v1962_v57 = vadd.f32 %v3244_v39, %v1863_v48  ;;  %v258_v47 = vld [vmem:[%s4058_s3] sm:$0xf] }
 0x2f6   : > { %v1954_v42 = vpop.f32.mrf.mxu0 }
 0x2f7   : > { %v1955_v62 = vadd.f32 %v1954_v42, %v1857_v50 }
 0x2f8   : > { %v3233_v41 = vpop.f32.mrf.mxu1 }
 0x2f9   : > { %v1875_v61 = vadd.f32 %v3233_v41, %v1766_v56 }
 0x2fa   : > { %v1868_v45 = vpop.f32.mrf.mxu1 }
 0x2fb   : > { %v3247_v49 = vpop.f32.mrf.mxu0  ;;  %v1869_v1 = vadd.f32 %v1868_v45, %v1756_v60 }
 0x2fc   : > { %v1976_v4 = vadd.f32 %v3247_v49, %v1875_v61 }
 0x2fd   : > { %v1968_v54 = vpop.f32.mrf.mxu0 }
 0x2fe   : > { %v3258_v55 = vpop.f32.mrf.mxu1  ;;  %v1969_v8 = vadd.f32 %v1968_v54, %v1869_v1 }
 0x2ff   : > { %v2061_v63 = vadd.f32 %v3258_v55, %v1962_v57  ;;  %v2328_v55 = vsel %vm953_vm2, %v258_v47, 0 }
 0x300   : > { %v2052_v58 = vpop.f32.mrf.mxu1  ;;  %v3272_v59 = vpop.f32.mrf.mxu0 }
 0x301   : > { %v2053_v3 = vadd.f32 %v2052_v58, %v1955_v62  ;;  %v2166_v6 = vadd.f32 %v3272_v59, %v2061_v63  ;;  %v3941_v59 = vand.u32 4294901760, %v2328_v55 }
 0x302   : > { %v2159_v0 = vpop.f32.mrf.mxu0  ;;  %v3261_v2 = vpop.f32.mrf.mxu1 }
 0x303   : > { %v2077_v9 = vadd.f32 %v3261_v2, %v1976_v4  ;;  %v2160_v52 = vadd.f32 %v2159_v0, %v2053_v3  ;;  %v3944_v2 = vsub.f32 %v2328_v55, %v3941_v59 }
 0x304   : > { %v2068_v5 = vpop.f32.mrf.mxu1  ;;  %v3275_v7 = vpop.f32.mrf.mxu0 }
 0x305   : > { %v2069_v13 = vadd.f32 %v2068_v5, %v1969_v8  ;;  %v2178_v19 = vadd.f32 %v3275_v7, %v2077_v9  ;;  %v2401_v9 = vand.u32 4294901760, %v3944_v2 }
 0x306   : > { %v2171_v15 = vpop.f32.mrf.mxu0 }
 0x307   : > { %v3286_v10 = vpop.f32.mrf.mxu1  ;;  %v2172_v24 = vadd.f32 %v2171_v15, %v2069_v13 }
 0x308   : > { %v2259_v53 = vadd.f32 %v3286_v10, %v2166_v6 }
 0x309   : > { %v2252_v14 = vpop.f32.mrf.mxu1 }
 0x30a   : > { %v2275_v16 = vmul.f32 1.1915, %v2259_v53  ;;  %v2299_v17 = vmul.f32 2.383, %v2259_v53  ;;  %v2253_v18 = vadd.f32 %v2252_v14, %v2160_v52 }
 0x30b   : > { %v3289_v20 = vpop.f32.mrf.mxu1 }
 0x30c   : > { %v2303_v21 = vmul.f32 %v2299_v17, %v2259_v53  ;;  %v2274_v22 = vmul.f32 1.1915, %v2253_v18  ;;  %v2298_v23 = vmul.f32 2.383, %v2253_v18  ;;  %v2271_v25 = vadd.f32 %v3289_v20, %v2178_v19 }
 0x30d   : > { %v2264_v26 = vpop.f32.mrf.mxu1  ;;  %v2279_v27 = vadd.f32 1.5957, %v2275_v16  ;;  %v2402_v17 = vsub.f32 %v3944_v2, %v2401_v9 }
 0x30e   : > { %v2307_v28 = vand.u32 2147483647, %v2303_v21  ;;  %v2302_v29 = vmul.f32 %v2298_v23, %v2253_v18  ;;  %v2277_v30 = vmul.f32 1.1915, %v2271_v25  ;;  %v2301_v31 = vmul.f32 2.383, %v2271_v25 }
 0x30f   : > { %v2265_v32 = vadd.f32 %v2264_v26, %v2172_v24  ;;  %v2278_v11 = vadd.f32 1.5957, %v2274_v22  ;;  %v2283_v37 = vmul.f32 %v2279_v27, %v2259_v53  ;;  %v2403_v24 = vand.u32 4294901760, %v2402_v17 }
 0x310   : > { %v2311_v33 = vadd.f32 1.0, %v2307_v28  ;;  %v2306_v51 = vand.u32 2147483647, %v2302_v29  ;;  %v2305_v34 = vmul.f32 %v2301_v31, %v2271_v25  ;;  %v2281_v39 = vadd.f32 1.5957, %v2277_v30 }
 0x311   : > { %v2276_v35 = vmul.f32 1.1915, %v2265_v32  ;;  %v2300_v36 = vmul.f32 2.383, %v2265_v32  ;;  %v2282_v42 = vmul.f32 %v2278_v11, %v2253_v18  ;;  %v2287_v46 = vadd.f32 0.5, %v2283_v37 }
 0x312   : > { %3432 = vrcp.f32 %v2311_v33  ;;  %v2310_v38 = vadd.f32 1.0, %v2306_v51  ;;  %v2309_v40 = vand.u32 2147483647, %v2305_v34  ;;  %v2285_v48 = vmul.f32 %v2281_v39, %v2271_v25 }
 0x313   : > { %v2304_v41 = vmul.f32 %v2300_v36, %v2265_v32  ;;  %v2280_v44 = vadd.f32 1.5957, %v2276_v35  ;;  %v2286_v50 = vadd.f32 0.5, %v2282_v42  ;;  %v2291_v56 = vmul.f32 %v2287_v46, %v2259_v53 }
 0x314   : > { %3434 = vrcp.f32 %v2310_v38  ;;  %v2313_v43 = vadd.f32 1.0, %v2309_v40  ;;  %v2289_v57 = vadd.f32 0.5, %v2285_v48  ;;  %v2325_v38 = vpop.permute.xlu0 %2324 }
 0x315   : > { %v2308_v45 = vand.u32 2147483647, %v2304_v41  ;;  %v2284_v54 = vmul.f32 %v2280_v44, %v2265_v32  ;;  %v2290_v58 = vmul.f32 %v2286_v50, %v2253_v18  ;;  %v2295_v61 = vadd.f32 0.0218, %v2291_v56 }
 0x316   : > { %3436 = vrcp.f32 %v2313_v43  ;;  %v2293_v63 = vmul.f32 %v2289_v57, %v2271_v25 }
 0x317   : > { %v2312_v49 = vadd.f32 1.0, %v2308_v45  ;;  %v2288_v60 = vadd.f32 0.5, %v2284_v54  ;;  %v2294_v1 = vadd.f32 0.0218, %v2290_v58 }
 0x318   : > { %v2297_v6 = vadd.f32 0.0218, %v2293_v63 }
 0x319   : > { %3438 = vrcp.f32 %v2312_v49  ;;  %v2292_v4 = vmul.f32 %v2288_v60, %v2265_v32 }
 0x31b   : > { %v2296_v52 = vadd.f32 0.0218, %v2292_v4 }
 0x31f   : > { %v3433_v62 = vpop.eup %3432 }
 0x320   : > { %v2319_v0 = vmul.f32 %v3433_v62, %v2295_v61 }
 0x321   : > { %v3435_v3 = vpop.eup %3434 }
 0x322   : > { %v2318_v5 = vmul.f32 %v3435_v3, %v2294_v1  ;;  %v3946_v7 = vand.u32 4294901760, %v2319_v0 }
 0x323   : > { %v3437_v8 = vpop.eup %3436 }
 0x324   : > { %v2321_v10 = vmul.f32 %v3437_v8, %v2297_v6  ;;  %v3949_v53 = vand.u32 4294901760, %v2318_v5  ;;  %v2449_v16 = vsub.f32 %v2319_v0, %v3946_v7 }
 0x326   : > { %v3439_v13 = vpop.eup %3438  ;;  %v3951_v14 = vand.u32 4294901760, %v2321_v10  ;;  %v2456_v20 = vsub.f32 %v2318_v5, %v3949_v53  ;;  %v2450_v23 = vand.u32 4294901760, %v2449_v16 }
 0x327   : > { %v2320_v15 = vmul.f32 %v3439_v13, %v2296_v52 }
 0x328   : > { %3291 = vmatpush3.msra.mxu0 %v3951_v14  ;;  %v2435_v18 = vsub.f32 %v2321_v10, %v3951_v14  ;;  %v2457_v27 = vand.u32 4294901760, %v2456_v20  ;;  %v2451_v30 = vsub.f32 %v2449_v16, %v2450_v23 }
 0x329   : > { %v3959_v19 = vand.u32 4294901760, %v2320_v15  ;;  %3292 = vmatprep.subr.mxu0 %v3519_v12 }
 0x32a   : > { %v2436_v22 = vand.u32 4294901760, %v2435_v18  ;;  %v2458_v32 = vsub.f32 %v2456_v20, %v2457_v27  ;;  %v2452_v33 = vand.u32 4294901760, %v2451_v30 }
 0x32b   : > { %3293 = vmatpush3.msra.mxu0 %v3959_v19  ;;  %v2442_v21 = vsub.f32 %v2320_v15, %v3959_v19 }
 0x32c   : > { %3294 = vmatprep.subr.mxu0 %v3519_v12  ;;  %v2437_v25 = vsub.f32 %v2435_v18, %v2436_v22  ;;  %v2459_v11 = vand.u32 4294901760, %v2458_v32 }
 0x32d   : > { %3295 = vmatpush3.msra.mxu0 %v3946_v7  ;;  %v2443_v26 = vand.u32 4294901760, %v2442_v21 }
 0x32e   : > { %3296 = vmatprep.subr.mxu0 %v3519_v12  ;;  %v2438_v28 = vand.u32 4294901760, %v2437_v25 }
 0x32f   : > { %3297 = vmatpush3.msra.mxu0 %v3949_v53  ;;  %v2444_v29 = vsub.f32 %v2442_v21, %v2443_v26 }
 0x330   : > { %3299 = vmatmul.mubr.f32.vlgmr.msra.gmra.mxu0 %v2403_v24  ;;  %3312 = vmatprep.subr.mxu0 %v3519_v12 }
 0x331   : > { %3302 = vmatpush3.msra.mxu1 %v2438_v28  ;;  %3313 = vmatpush3.msra.mxu0 %v2435_v18  ;;  %v2445_v31 = vand.u32 4294901760, %v2444_v29 }
 0x332   : > { %3303 = vmatprep.subr.mxu1 %v3519_v12  ;;  %3314 = vmatprep.subr.mxu0 %v3519_v12 }
 0x333   : > { %3304 = vmatpush3.msra.mxu1 %v2445_v31  ;;  %3315 = vmatpush3.msra.mxu0 %v2442_v21 }
 0x334   : > { %3305 = vmatprep.subr.mxu1 %v3519_v12  ;;  %3316 = vmatprep.subr.mxu0 %v3519_v12 }
 0x335   : > { %3306 = vmatpush3.msra.mxu1 %v2452_v33  ;;  %3317 = vmatpush3.msra.mxu0 %v2449_v16 }
 0x336   : > { %3307 = vmatprep.subr.mxu1 %v3519_v12  ;;  %3318 = vmatprep.subr.mxu0 %v3519_v12 }
 0x337   : > { %3308 = vmatpush3.msra.mxu1 %v2459_v11  ;;  %3319 = vmatpush3.msra.mxu0 %v2456_v20 }
 0x338   : > { %3310 = vmatmul.mubr.f32.vlgmr.msra.gmra.mxu1 %v3941_v59  ;;  %3320 = vmatprep.mubr.msk.f32.mxu0 %vm3520_vm3, %v3519_v12 }
 0x339   : > { %3323 = vmatprep.subr.mxu1 %v3519_v12  ;;  %3334 = vmatprep.subr.mxu0 %v3519_v12 }
 0x33a   : > { %3321 = vmatmul.mubr.f32.vlgmr.msra.gmra.mxu0 %v3944_v2  ;;  %3324 = vmatpush3.msra.mxu1 %v3951_v14 }
 0x33b   : > { %3335 = vmatpush3.msra.mxu0 %v2436_v22  ;;  %3325 = vmatprep.subr.mxu1 %v3519_v12 }
 0x33c   : > { %3336 = vmatprep.subr.mxu0 %v3519_v12  ;;  %3326 = vmatpush3.msra.mxu1 %v3959_v19 }
 0x33d   : > { %3337 = vmatpush3.msra.mxu0 %v2443_v26  ;;  %3327 = vmatprep.subr.mxu1 %v3519_v12 }
 0x33e   : > { %3338 = vmatprep.subr.mxu0 %v3519_v12  ;;  %3328 = vmatpush3.msra.mxu1 %v3946_v7 }
 0x33f   : > { %3339 = vmatpush3.msra.mxu0 %v2450_v23  ;;  %3329 = vmatprep.subr.mxu1 %v3519_v12 }
 0x340   : > { %3340 = vmatprep.subr.mxu0 %v3519_v12  ;;  %3330 = vmatpush3.msra.mxu1 %v3949_v53 }
 0x341   : > { %3331 = vmatprep.mubr.msk.f32.mxu1 %vm3520_vm3, %v3519_v12  ;;  %3341 = vmatpush3.msra.mxu0 %v2457_v27 }
 0x342   : > { %3332 = vmatmul.mubr.f32.vlgmr.msra.gmra.mxu1 %v2401_v9  ;;  %3345 = vmatprep.subr.mxu1 %v3519_v12 }
 0x343   : > { %3342 = vmatprep.mubr.msk.f32.mxu0 %vm3520_vm3, %v3519_v12  ;;  %3346 = vmatpush3.msra.mxu1 %v3951_v14 }
 0x344   : > { %3343 = vmatmul.mubr.f32.vlgmr.msra.gmra.mxu0 %v3941_v59  ;;  %3347 = vmatprep.subr.mxu1 %v3519_v12 }
 0x345   : > { %3348 = vmatpush3.msra.mxu1 %v3959_v19  ;;  %3353 = vmatprep.mubr.msk.f32.mxu1 %vm3520_vm3, %v3519_v12 }
 0x346   : > { %3349 = vmatprep.subr.mxu1 %v3519_v12 }
 0x347   : > { %3350 = vmatpush3.msra.mxu1 %v3946_v7 }
 0x348   : > { %3351 = vmatprep.subr.mxu1 %v3519_v12 }
 0x349   : > { %3352 = vmatpush3.msra.mxu1 %v3949_v53 }
 0x34a   : > { %3354 = vmatmul.mubr.f32.vlgmr.msra.gmra.mxu1 %v3941_v59 }
 0x3f0   : > { %v2405_v51 = vpop.f32.mrf.mxu0 }
 0x3f1   : > { %v2406_v40 = vadd.f32 %v2405_v51, %v2325_v38 }
 0x3f2   : > { %v3300_v34 = vpop.f32.mrf.mxu0 }
 0x3f8   : > { %v2496_v35 = vpop.f32.mrf.mxu1 }
 0x3f9   : > { %v2497_v41 = vadd.f32 %v2496_v35, %v2406_v40 }
 0x3fa   : > { %v3311_v36 = vpop.f32.mrf.mxu1  ;;  %v2576_v37 = vpop.f32.mrf.mxu0 }
 0x3fb   : > { %v2577_v43 = vadd.f32 %v2576_v37, %v2497_v41 }
 0x3fc   : > { %v3322_v39 = vpop.f32.mrf.mxu0 }
 0x402   : > { %v2653_v42 = vpop.f32.mrf.mxu1 }
 0x403   : > { %v2654_v45 = vadd.f32 %v2653_v42, %v2577_v43 }
 0x404   : > { %v3333_v44 = vpop.f32.mrf.mxu1  ;;  %v2736_v12 = vpop.f32.mrf.mxu0 }
 0x405   : > { %v2737_v47 = vadd.f32 %v2736_v12, %v2654_v45 }
 0x406   : > { %v3344_v46 = vpop.f32.mrf.mxu0 }
 0x40a   : > { %v2811_v48 = vpop.f32.mrf.mxu1 }
 0x40b   : > { %v2812_v49 = vadd.f32 %v2811_v48, %v2737_v47 }
 0x40c   : > { %v3355_v50 = vpop.f32.mrf.mxu1 }
 0x40d   : > { %2816 = vst.msk [vmem:[%s237_s7] sm:$0xf] %vm2815_vm4, %v2812_v49 }
 0x40e   : > { %3453 = shalt.err (!%p3450_p5)
}
 0x40f   : > { %s3454_s16 = scalar_lea.hbm %s4015_s11, 64  ;;  %s3458_s25 = scalar_lea.hbm %s4060_s5, 128 }
 0x410   : > { %p3455_p6 = scmp.ne.s32.totalorder %s4015_s11, %s3454_s16  ;;  %p3459_p10 = scmp.lt.s32.totalorder %s4015_s11, %s4060_s5 }
 0x411   : > { %p3460_p11 = scmp.lt.s32.totalorder %s3458_s25, %s3454_s16 }
 0x412   : > { %p3456_p7 = pnand %p3455_p6, %p3592_p4 }
 0x413   : > { %p3461_p12 = por %p3460_p11, %p3459_p10 }
 0x414   : > { %p3457_p9 = pneg %p3456_p7 }
 0x416   : > { %p3462_p13 = pnand %p3461_p12, %p3457_p9 }
 0x418   : > { %3465 = shalt.err (!%p3462_p13)
}
 0x419   : > { %3356 = dma.vmem_to_hbm [thread:$0]  (%p3592_p4), %s2833_s8, 64, %s4015_s11, %s2818_s12  }
 0x41a PF: > { %p3362_p0 = scmp.ge.s32.totalorder %s3516_s23, 2  ;;  %s2844_s7 = sand.u32 1, %s3496_s18  }
 0x41b   : > { %s2845_s9 = scalar_lea.sflag [#allocation3], %s2844_s7 }
 0x41c   : > { %p3359_p1 = pnand %p3362_p0, %p3599_p8 }
 0x41e   : > { %p3360_p2 = pneg %p3359_p1 }
 0x420   : > { %3491 = dma.done.wait (%p3360_p2), %s2845_s9, 64  }
 0x421   : > { %3493 = vsyncadd (%p3360_p2), %s2845_s9, 4294967232  ;;  %s18_s23 = sadd.s32 1, %s3516_s23   ;;  %s4063_s18 = smov %s3500_s19 }
 0x422   : > { %p15_p3 = scmp.ge.s32.totalorder %s18_s23, 4   ;;  %s4064_s19 = smov %s3504_s20 }
 0x423   : > { %s4065_s20 = smov %s3605_s6  ;;  %s4066_s21 = smov %s3512_s22 }
 0x424   : > { %s4067_s22 = smov %s4069_s26  ;;  %17 = sbr.rel (!%p15_p3) target bundleno = 4 (0x4), region = 76 }
 0x429   :  { %2850 = vsyncpa [#allocation3], 1 }
 0x42a   :  { %2852 = vsyncpa [#allocation3 + $0x1], 1 }

</bundles_post_ra>
